<compile_context>
chip_gen: v7x
topology: tpu7x:2x2x1
jax: 0.10.0
libtpu: 0.0.40
codegen_flags: <defaults>
</compile_context>

<pallas_src>
import math

import jax
import jax.numpy as jnp
from jax.experimental import pallas as pl
from jax.experimental.pallas import tpu as pltpu


# --------------------------------- kernel ------------------------------------------

def _subpixel_conv_kernel(body_ref, halo_ref, w_ref, b_ref, o_ref, xt_ref):
    """One (batch, row-tile) grid step: 4 sub-pixel 2x2 convs on an original-res tile.

    body_ref: (1, TH, W+2, C)    padded rows [t*TH, t*TH+TH) of the input (bf16)
    halo_ref: (1, 2,  W+2, C)    padded rows t*TH+TH, t*TH+TH+1 (bottom halo, bf16)
    w_ref:    (4, 4, C, C)       folded weights [sub-pixel s=2a+b, tap k=2ry+rx] (bf16)
    b_ref:    (1, 2C)            bias tiled twice along the column-phase axis (f32)
    o_ref:    (1, TH, 2, W, 2C)  interleaved output: o[0,i,a,j,b*C+c] = y[2i+a, 2j+b, c]
    xt_ref:   (TH+2, W+2, C)     VMEM scratch: body + 2-row bottom halo, stitched
    """
    TH = body_ref.shape[1]
    Wp = body_ref.shape[2]
    C = body_ref.shape[3]
    W = Wp - 2

    # Stitch the TH-row body block and its 2-row bottom halo into one contiguous tile.
    # TODO(synk): an element-indexed overlapping (TH+2)-row input window would remove
    # this VMEM->VMEM copy and the separate halo gather in the wrapper entirely.
    xt_ref[0:TH] = body_ref[0]
    xt_ref[TH:TH + 2] = halo_ref[0]

    # Three column-shifted slabs ((TH+2)*W, C), hoisted: one sublane shift per column
    # offset, reused by every tap (the row shift below is a cheap contiguous slice).
    xcol = [xt_ref[:, v:v + W, :].reshape((TH + 2) * W, C) for v in range(3)]

    bias2 = b_ref[...].astype(jnp.float32)                 # (1, 2C), broadcasts over rows

    # TODO(synk): for compute-bound large-C cases on v6e/v7x, the 16 dots below can be
    # merged into 9 fatter dots (group taps by the 9 distinct shifted slabs and stack
    # per-sub-pixel weights along the output dim) to better fill the 256-wide MXU.
    for a in (0, 1):                                       # output row phase (even/odd)
        cols = []
        for b in (0, 1):                                   # output column phase
            s = 2 * a + b
            acc = jnp.zeros((TH * W, C), jnp.float32)      # tile-sized f32 accumulator
            for k in range(4):                             # 2x2 tap (ry, rx)
                ry, rx = divmod(k, 2)
                lo = (a + ry) * W                          # row shift = contiguous slice
                acc = acc + jnp.dot(
                    xcol[b + rx][lo:lo + TH * W],          # (TH*W, C) bf16
                    w_ref[s, k],                           # (C, C)    bf16
                    preferred_element_type=jnp.float32)    # f32 MXU accumulation
            cols.append(acc.reshape(TH, W, C))
        # Interleave the two column phases along the lane dim -> one dense (TH, W, 2C)
        # store per row phase (no masked narrow-C stores).
        row = jnp.concatenate(cols, axis=-1) + bias2       # (TH, W, 2C) f32
        o_ref[0, :, a] = row.astype(o_ref.dtype)


# ----------------------------- tiling / VMEM budgeting ------------------------------

def _round_up(v, m):
    return -(-v // m) * m


def _padded_bytes(shape, itemsize):
    """Approximate VMEM footprint: last dim rounded to 128 lanes, second-minor to 8."""
    dims = list(shape)
    dims[-1] = _round_up(dims[-1], 128)
    if len(dims) >= 2:
        dims[-2] = _round_up(dims[-2], 8)
    n = 1
    for d in dims:
        n *= int(d)
    return n * itemsize


def _footprint_bytes(TH, W, C, out_itemsize):
    """Per-grid-step VMEM working set (double-buffered blocks + scratch + temporaries)."""
    body = 2 * _padded_bytes((TH, W + 2, C), 2)            # bf16 input block, 2 buffers
    halo = 2 * _padded_bytes((2, W + 2, C), 2)
    wsub = 2 * _padded_bytes((16, C, C), 2)                # resident weights (2 copies)
    bias = 2 * _padded_bytes((1, 2 * C), 4)
    outb = 2 * _padded_bytes((2 * TH, W, 2 * C), out_itemsize)
    xt = _padded_bytes((TH + 2, W + 2, C), 2)              # stitch scratch
    slabs = 3 * _padded_bytes(((TH + 2) * W, C), 2)        # hoisted column-shifted slabs
    accs = 4 * _padded_bytes((TH * W, C), 4)               # live f32 accumulators
    return body + halo + wsub + bias + outb + xt + slabs + accs


def _vmem_capacity_bytes():
    try:
        cap = getattr(pltpu.get_tpu_info(), "vmem_capacity_bytes", None)
        if cap:
            return int(cap)
    except Exception:
        pass
    return 64 * 1024 * 1024        # conservative (v7x-sized) fallback


def _pick_tile_h(H, W, C, out_itemsize, budget_bytes, tile_h):
    """Largest divisor of H (<= optional cap) whose per-step footprint fits the budget."""
    divisors = [d for d in range(1, H + 1) if H % d == 0]
    cap = H if tile_h is None else max(1, min(int(tile_h), H))
    cands = [d for d in divisors if d <= cap] or divisors
    fitting = [d for d in cands
               if _footprint_bytes(d, W, C, out_itemsize) <= budget_bytes]
    return max(fitting) if fitting else min(cands)


# ---------------------------------- wrapper -----------------------------------------

def upsample_forward(x, weight, bias, *, tile_h=None, out_dtype=None,
                     out_layout="NCHW", vmem_budget_bytes=None):
    """x: (N, C, H, W) NCHW.  weight: (C, C, 3, 3) OIHW.  bias: (C,).
    Nearest-2x upsample followed by 3x3 'same' conv (== Upsample.forward).
    Returns (N, C, 2H, 2W) for out_layout="NCHW" (default) or (N, 2H, 2W, C) for
    out_layout="NHWC" (skips the final transpose).  out_dtype defaults to x.dtype;
    pass jnp.bfloat16 to halve the dominant output HBM traffic."""
    N, C, H, W = map(int, x.shape)
    out_dtype = x.dtype if out_dtype is None else jnp.dtype(out_dtype)
    out_itemsize = jnp.dtype(out_dtype).itemsize

    cap = _vmem_capacity_bytes()
    if vmem_budget_bytes is None:
        # Leave ~1/3 of physical VMEM for Mosaic internals / pipeline slack
        # (v7x: ~42 MiB usable of 64 MiB; v5e/v6e: ~85 MiB of 128 MiB).
        vmem_budget_bytes = int(0.65 * cap)
    TH = _pick_tile_h(H, W, C, out_itemsize, vmem_budget_bytes, tile_h)
    HT = H // TH
    fp = _footprint_bytes(TH, W, C, out_itemsize)
    vmem_limit = int(min(max(32 * 1024 * 1024, int(1.4 * fp)), int(0.95 * cap)))

    # ---- glue passes only touch the ORIGINAL-resolution x (the 4x upsampled image is
    #      never materialized in HBM) ----
    x_nhwc = jnp.transpose(x, (0, 2, 3, 1)).astype(jnp.bfloat16)     # (N, H, W, C)
    xp = jnp.pad(x_nhwc, ((0, 0), (1, 1), (1, 1), (0, 0)))           # (N, H+2, W+2, C)
    body = xp[:, :H]                                                 # (N, H, W+2, C)
    # 2-row bottom halo per row tile (2/TH of x), pre-gathered so every BlockSpec stays
    # plainly block-indexed.
    halo = jnp.stack([xp[:, TH:H + 1:TH], xp[:, TH + 1:H + 2:TH]], axis=2)
    halo = halo.reshape(N, 2 * HT, W + 2, C)                         # (N, 2*HT, W+2, C)

    # ---- fold the 3x3 kernel into 4 sub-pixel 2x2 kernels (nearest-2x structure) ----
    # Sub-pixel row phase a, tap ry sums dy in D(a,ry) with D(0,0)={0}, D(0,1)={1,2},
    # D(1,0)={0,1}, D(1,1)={2}; identically for columns (b, rx, dx).
    w_hwio = jnp.transpose(weight, (2, 3, 1, 0)).astype(jnp.float32)  # (3, 3, Ci, Co)
    S = jnp.array([[[1., 0., 0.], [0., 1., 1.]],
                   [[1., 1., 0.], [0., 0., 1.]]], jnp.float32)        # S[a, r, dy]
    w_sub = jnp.einsum('ard,bse,deio->abrsio', S, S, w_hwio)          # (2,2,2,2,Ci,Co)
    w_sub = w_sub.reshape(4, 4, C, C).astype(jnp.bfloat16)            # [s=2a+b, k=2ry+rx]
    b2 = jnp.concatenate([bias, bias]).reshape(1, 2 * C).astype(jnp.float32)

    out = pl.pallas_call(
        _subpixel_conv_kernel,
        out_shape=jax.ShapeDtypeStruct((N, H, 2, W, 2 * C), out_dtype),
        grid_spec=pltpu.PrefetchScalarGridSpec(
            num_scalar_prefetch=0,
            grid=(N, HT),
            in_specs=[
                pl.BlockSpec((1, TH, W + 2, C), lambda n, t: (n, t, 0, 0)),
                pl.BlockSpec((1, 2, W + 2, C), lambda n, t: (n, t, 0, 0)),
                # Constant-index (resident) weights / bias.
                # TODO(synk): pipeline_mode=pl.Buffered(1) would drop their second
                # pipeline buffer (matters for large C on v7x's 64 MiB VMEM).
                pl.BlockSpec((4, 4, C, C), lambda n, t: (0, 0, 0, 0)),
                pl.BlockSpec((1, 2 * C), lambda n, t: (0, 0)),
            ],
            out_specs=pl.BlockSpec((1, TH, 2, W, 2 * C),
                                   lambda n, t: (n, t, 0, 0, 0)),
            scratch_shapes=[pltpu.VMEM((TH + 2, W + 2, C), jnp.bfloat16)],
        ),
        compiler_params=pltpu.CompilerParams(
            dimension_semantics=("parallel", "parallel"),
            vmem_limit_bytes=vmem_limit,
        ),
    )(body, halo, w_sub, b2)

    # (N, H, 2, W, 2C) is row-major identical to (N, 2H, 2W, C): this reshape is free.
    y_nhwc = out.reshape(N, 2 * H, 2 * W, C)
    if out_layout == "NHWC":
        return y_nhwc
    # The only remaining XLA pass over the 4x-sized output: plain NHWC -> NCHW transpose.
    return jnp.transpose(y_nhwc, (0, 3, 1, 2))


def init_params(key, dim):
    """Deterministic init mirroring nn.Conv2d default (kaiming-uniform bounds)."""
    kw, kb = jax.random.split(key)
    fan_in = dim * 3 * 3
    wb = math.sqrt(1.0 / fan_in)
    weight = jax.random.uniform(kw, (dim, dim, 3, 3), jnp.float32, -wb, wb)
    bias = jax.random.uniform(kb, (dim,), jnp.float32, -wb, wb)
    return weight, bias


if __name__ == "__main__":
    key = jax.random.PRNGKey(0)
    kx, kp = jax.random.split(key)

    N, C, H, W = 2, 4, 16, 16
    x = jax.random.normal(kx, (N, C, H, W), jnp.float32)
    weight, bias = init_params(kp, C)

    fwd = jax.jit(lambda a, w, b: upsample_forward(a, w, b))
    y = jax.block_until_ready(fwd(x, weight, bias))

    # Pure-JAX reference (same semantics as torch: nearest up x2 then 3x3 conv, pad=1).
    x_up = jnp.repeat(jnp.repeat(x, 2, axis=2), 2, axis=3)
    ref = jax.lax.conv_general_dilated(
        x_up, weight, window_strides=(1, 1), padding=((1, 1), (1, 1)),
        dimension_numbers=("NCHW", "OIHW", "NCHW")) + bias.reshape(1, C, 1, 1)

    assert y.shape == (N, C, 2 * H, 2 * W)
    # bf16 MXU operands with f32 accumulation -> loosened tolerance vs f32 reference.
    assert jnp.allclose(y, ref, atol=5e-2, rtol=5e-2), float(jnp.max(jnp.abs(y - ref)))
    print("KERNEL_OK")
</pallas_src>

<mosaic_0001>
module attributes {stable_mosaic.version = 11 : i64} {
  func.func @_subpixel_conv_kernel(%arg0: i32, %arg1: i32, %arg2: memref<1x16x18x4xbf16, #tpu.memory_space<vmem>>, %arg3: memref<1x2x18x4xbf16, #tpu.memory_space<vmem>>, %arg4: memref<4x4x4x4xbf16, #tpu.memory_space<vmem>>, %arg5: memref<1x8xf32, #tpu.memory_space<vmem>>, %arg6: memref<1x16x2x16x8xf32, #tpu.memory_space<vmem>>, %arg7: memref<18x18x4xbf16, #tpu.memory_space<vmem>>) attributes {dimension_semantics = [#tpu.dimension_semantics<parallel>, #tpu.dimension_semantics<parallel>], iteration_bounds = array<i64: 2, 1>, scalar_prefetch = 0 : i64, scratch_operands = 1 : i64, tpu.core_type = #tpu.core_type<tc>, window_params = [{transform_indices = @transform_0, window_bounds = array<i64: 1, 16, 18, 4>}, {transform_indices = @transform_1, window_bounds = array<i64: 1, 2, 18, 4>}, {pipeline_mode = #tpu.pipeline_mode<synchronous>, transform_indices = @transform_2, window_bounds = array<i64: 4, 4, 4, 4>}, {pipeline_mode = #tpu.pipeline_mode<synchronous>, transform_indices = @transform_3, window_bounds = array<i64: 1, 8>}, {transform_indices = @transform_4, window_bounds = array<i64: 1, 16, 2, 16, 8>}]} {
    %c0 = arith.constant 0 : index
    %c0_0 = arith.constant 0 : index
    %c0_1 = arith.constant 0 : index
    %c0_2 = arith.constant 0 : index
    %0 = vector.load %arg2[%c0, %c0_0, %c0_1, %c0_2] : memref<1x16x18x4xbf16, #tpu.memory_space<vmem>>, vector<1x16x18x4xbf16>
    %1 = vector.shape_cast %0 : vector<1x16x18x4xbf16> to vector<16x18x4xbf16>
    %c0_3 = arith.constant 0 : index
    %c0_4 = arith.constant 0 : index
    %c0_5 = arith.constant 0 : index
    %2 = vector.load %arg7[%c0_3, %c0_4, %c0_5] : memref<18x18x4xbf16, #tpu.memory_space<vmem>>, vector<16x18x4xbf16>
    tpu.vector_store %arg7[%c0_3, %c0_4, %c0_5], %1 {strides = array<i32>} : memref<18x18x4xbf16, #tpu.memory_space<vmem>>, vector<16x18x4xbf16>,
    %c0_6 = arith.constant 0 : index
    %c0_7 = arith.constant 0 : index
    %c0_8 = arith.constant 0 : index
    %c0_9 = arith.constant 0 : index
    %3 = vector.load %arg3[%c0_6, %c0_7, %c0_8, %c0_9] : memref<1x2x18x4xbf16, #tpu.memory_space<vmem>>, vector<1x2x18x4xbf16>
    %4 = vector.shape_cast %3 : vector<1x2x18x4xbf16> to vector<2x18x4xbf16>
    %c16 = arith.constant 16 : index
    %c0_10 = arith.constant 0 : index
    %c0_11 = arith.constant 0 : index
    %5 = vector.load %arg7[%c16, %c0_10, %c0_11] : memref<18x18x4xbf16, #tpu.memory_space<vmem>>, vector<2x18x4xbf16>
    tpu.vector_store %arg7[%c16, %c0_10, %c0_11], %4 {strides = array<i32>} : memref<18x18x4xbf16, #tpu.memory_space<vmem>>, vector<2x18x4xbf16>,
    %c0_12 = arith.constant 0 : index
    %c0_13 = arith.constant 0 : index
    %c0_14 = arith.constant 0 : index
    %6 = vector.load %arg7[%c0_12, %c0_13, %c0_14] : memref<18x18x4xbf16, #tpu.memory_space<vmem>>, vector<18x16x4xbf16>
    %7 = vector.shape_cast %6 : vector<18x16x4xbf16> to vector<288x4xbf16>
    %c0_15 = arith.constant 0 : index
    %c1 = arith.constant 1 : index
    %c0_16 = arith.constant 0 : index
    %8 = vector.load %arg7[%c0_15, %c1, %c0_16] : memref<18x18x4xbf16, #tpu.memory_space<vmem>>, vector<18x16x4xbf16>
    %9 = vector.shape_cast %8 : vector<18x16x4xbf16> to vector<288x4xbf16>
    %c0_17 = arith.constant 0 : index
    %c2 = arith.constant 2 : index
    %c0_18 = arith.constant 0 : index
    %10 = vector.load %arg7[%c0_17, %c2, %c0_18] : memref<18x18x4xbf16, #tpu.memory_space<vmem>>, vector<18x16x4xbf16>
    %11 = vector.shape_cast %10 : vector<18x16x4xbf16> to vector<288x4xbf16>
    %c0_19 = arith.constant 0 : index
    %c0_20 = arith.constant 0 : index
    %12 = vector.load %arg5[%c0_19, %c0_20] : memref<1x8xf32, #tpu.memory_space<vmem>>, vector<1x8xf32>
    %cst = arith.constant 0.000000e+00 : f32
    %13 = vector.broadcast %cst : f32 to vector<256x4xf32>
    %14 = vector.extract_strided_slice %7 {offsets = [0, 0], sizes = [256, 4], strides = [1, 1]} : vector<288x4xbf16> to vector<256x4xbf16>
    %c0_21 = arith.constant 0 : index
    %c0_22 = arith.constant 0 : index
    %c0_23 = arith.constant 0 : index
    %c0_24 = arith.constant 0 : index
    %15 = vector.load %arg4[%c0_21, %c0_22, %c0_23, %c0_24] : memref<4x4x4x4xbf16, #tpu.memory_space<vmem>>, vector<1x1x4x4xbf16>
    %16 = vector.shape_cast %15 : vector<1x1x4x4xbf16> to vector<4x4xbf16>
    %cst_25 = arith.constant dense<0.000000e+00> : vector<256x4xf32>
    %17 = tpu.matmul %14, %16, %cst_25 {dimension_numbers = #tpu.dot_dimension_numbers<[1], [0], [0], [1], [0, 0, 1, 1], [], []>} : vector<256x4xbf16>, vector<4x4xbf16>, vector<256x4xf32> -> vector<256x4xf32>
    %18 = arith.addf %13, %17 : vector<256x4xf32>
    %19 = vector.extract_strided_slice %9 {offsets = [0, 0], sizes = [256, 4], strides = [1, 1]} : vector<288x4xbf16> to vector<256x4xbf16>
    %c0_26 = arith.constant 0 : index
    %c1_27 = arith.constant 1 : index
    %c0_28 = arith.constant 0 : index
    %c0_29 = arith.constant 0 : index
    %20 = vector.load %arg4[%c0_26, %c1_27, %c0_28, %c0_29] : memref<4x4x4x4xbf16, #tpu.memory_space<vmem>>, vector<1x1x4x4xbf16>
    %21 = vector.shape_cast %20 : vector<1x1x4x4xbf16> to vector<4x4xbf16>
    %cst_30 = arith.constant dense<0.000000e+00> : vector<256x4xf32>
    %22 = tpu.matmul %19, %21, %cst_30 {dimension_numbers = #tpu.dot_dimension_numbers<[1], [0], [0], [1], [0, 0, 1, 1], [], []>} : vector<256x4xbf16>, vector<4x4xbf16>, vector<256x4xf32> -> vector<256x4xf32>
    %23 = arith.addf %18, %22 : vector<256x4xf32>
    %24 = vector.extract_strided_slice %7 {offsets = [16, 0], sizes = [256, 4], strides = [1, 1]} : vector<288x4xbf16> to vector<256x4xbf16>
    %c0_31 = arith.constant 0 : index
    %c2_32 = arith.constant 2 : index
    %c0_33 = arith.constant 0 : index
    %c0_34 = arith.constant 0 : index
    %25 = vector.load %arg4[%c0_31, %c2_32, %c0_33, %c0_34] : memref<4x4x4x4xbf16, #tpu.memory_space<vmem>>, vector<1x1x4x4xbf16>
    %26 = vector.shape_cast %25 : vector<1x1x4x4xbf16> to vector<4x4xbf16>
    %cst_35 = arith.constant dense<0.000000e+00> : vector<256x4xf32>
    %27 = tpu.matmul %24, %26, %cst_35 {dimension_numbers = #tpu.dot_dimension_numbers<[1], [0], [0], [1], [0, 0, 1, 1], [], []>} : vector<256x4xbf16>, vector<4x4xbf16>, vector<256x4xf32> -> vector<256x4xf32>
    %28 = arith.addf %23, %27 : vector<256x4xf32>
    %29 = vector.extract_strided_slice %9 {offsets = [16, 0], sizes = [256, 4], strides = [1, 1]} : vector<288x4xbf16> to vector<256x4xbf16>
    %c0_36 = arith.constant 0 : index
    %c3 = arith.constant 3 : index
    %c0_37 = arith.constant 0 : index
    %c0_38 = arith.constant 0 : index
    %30 = vector.load %arg4[%c0_36, %c3, %c0_37, %c0_38] : memref<4x4x4x4xbf16, #tpu.memory_space<vmem>>, vector<1x1x4x4xbf16>
    %31 = vector.shape_cast %30 : vector<1x1x4x4xbf16> to vector<4x4xbf16>
    %cst_39 = arith.constant dense<0.000000e+00> : vector<256x4xf32>
    %32 = tpu.matmul %29, %31, %cst_39 {dimension_numbers = #tpu.dot_dimension_numbers<[1], [0], [0], [1], [0, 0, 1, 1], [], []>} : vector<256x4xbf16>, vector<4x4xbf16>, vector<256x4xf32> -> vector<256x4xf32>
    %33 = arith.addf %28, %32 : vector<256x4xf32>
    %34 = vector.shape_cast %33 : vector<256x4xf32> to vector<16x16x4xf32>
    %cst_40 = arith.constant 0.000000e+00 : f32
    %35 = vector.broadcast %cst_40 : f32 to vector<256x4xf32>
    %36 = vector.extract_strided_slice %9 {offsets = [0, 0], sizes = [256, 4], strides = [1, 1]} : vector<288x4xbf16> to vector<256x4xbf16>
    %c1_41 = arith.constant 1 : index
    %c0_42 = arith.constant 0 : index
    %c0_43 = arith.constant 0 : index
    %c0_44 = arith.constant 0 : index
    %37 = vector.load %arg4[%c1_41, %c0_42, %c0_43, %c0_44] : memref<4x4x4x4xbf16, #tpu.memory_space<vmem>>, vector<1x1x4x4xbf16>
    %38 = vector.shape_cast %37 : vector<1x1x4x4xbf16> to vector<4x4xbf16>
    %cst_45 = arith.constant dense<0.000000e+00> : vector<256x4xf32>
    %39 = tpu.matmul %36, %38, %cst_45 {dimension_numbers = #tpu.dot_dimension_numbers<[1], [0], [0], [1], [0, 0, 1, 1], [], []>} : vector<256x4xbf16>, vector<4x4xbf16>, vector<256x4xf32> -> vector<256x4xf32>
    %40 = arith.addf %35, %39 : vector<256x4xf32>
    %41 = vector.extract_strided_slice %11 {offsets = [0, 0], sizes = [256, 4], strides = [1, 1]} : vector<288x4xbf16> to vector<256x4xbf16>
    %c1_46 = arith.constant 1 : index
    %c1_47 = arith.constant 1 : index
    %c0_48 = arith.constant 0 : index
    %c0_49 = arith.constant 0 : index
    %42 = vector.load %arg4[%c1_46, %c1_47, %c0_48, %c0_49] : memref<4x4x4x4xbf16, #tpu.memory_space<vmem>>, vector<1x1x4x4xbf16>
    %43 = vector.shape_cast %42 : vector<1x1x4x4xbf16> to vector<4x4xbf16>
    %cst_50 = arith.constant dense<0.000000e+00> : vector<256x4xf32>
    %44 = tpu.matmul %41, %43, %cst_50 {dimension_numbers = #tpu.dot_dimension_numbers<[1], [0], [0], [1], [0, 0, 1, 1], [], []>} : vector<256x4xbf16>, vector<4x4xbf16>, vector<256x4xf32> -> vector<256x4xf32>
    %45 = arith.addf %40, %44 : vector<256x4xf32>
    %46 = vector.extract_strided_slice %9 {offsets = [16, 0], sizes = [256, 4], strides = [1, 1]} : vector<288x4xbf16> to vector<256x4xbf16>
    %c1_51 = arith.constant 1 : index
    %c2_52 = arith.constant 2 : index
    %c0_53 = arith.constant 0 : index
    %c0_54 = arith.constant 0 : index
    %47 = vector.load %arg4[%c1_51, %c2_52, %c0_53, %c0_54] : memref<4x4x4x4xbf16, #tpu.memory_space<vmem>>, vector<1x1x4x4xbf16>
    %48 = vector.shape_cast %47 : vector<1x1x4x4xbf16> to vector<4x4xbf16>
    %cst_55 = arith.constant dense<0.000000e+00> : vector<256x4xf32>
    %49 = tpu.matmul %46, %48, %cst_55 {dimension_numbers = #tpu.dot_dimension_numbers<[1], [0], [0], [1], [0, 0, 1, 1], [], []>} : vector<256x4xbf16>, vector<4x4xbf16>, vector<256x4xf32> -> vector<256x4xf32>
    %50 = arith.addf %45, %49 : vector<256x4xf32>
    %51 = vector.extract_strided_slice %11 {offsets = [16, 0], sizes = [256, 4], strides = [1, 1]} : vector<288x4xbf16> to vector<256x4xbf16>
    %c1_56 = arith.constant 1 : index
    %c3_57 = arith.constant 3 : index
    %c0_58 = arith.constant 0 : index
    %c0_59 = arith.constant 0 : index
    %52 = vector.load %arg4[%c1_56, %c3_57, %c0_58, %c0_59] : memref<4x4x4x4xbf16, #tpu.memory_space<vmem>>, vector<1x1x4x4xbf16>
    %53 = vector.shape_cast %52 : vector<1x1x4x4xbf16> to vector<4x4xbf16>
    %cst_60 = arith.constant dense<0.000000e+00> : vector<256x4xf32>
    %54 = tpu.matmul %51, %53, %cst_60 {dimension_numbers = #tpu.dot_dimension_numbers<[1], [0], [0], [1], [0, 0, 1, 1], [], []>} : vector<256x4xbf16>, vector<4x4xbf16>, vector<256x4xf32> -> vector<256x4xf32>
    %55 = arith.addf %50, %54 : vector<256x4xf32>
    %56 = vector.shape_cast %55 : vector<256x4xf32> to vector<16x16x4xf32>
    %57 = tpu.concatenate %34, %56 in 2 : vector<16x16x4xf32>, vector<16x16x4xf32> -> vector<16x16x8xf32>
    %58 = vector.shape_cast %12 : vector<1x8xf32> to vector<1x1x8xf32>
    %59 = vector.broadcast %58 : vector<1x1x8xf32> to vector<16x16x8xf32>
    %60 = arith.addf %57, %59 : vector<16x16x8xf32>
    %c0_61 = arith.constant 0 : index
    %c0_62 = arith.constant 0 : index
    %c0_63 = arith.constant 0 : index
    %c0_64 = arith.constant 0 : index
    %c0_65 = arith.constant 0 : index
    %61 = vector.load %arg6[%c0_61, %c0_62, %c0_63, %c0_64, %c0_65] : memref<1x16x2x16x8xf32, #tpu.memory_space<vmem>>, vector<1x16x1x16x8xf32>
    %62 = vector.shape_cast %61 : vector<1x16x1x16x8xf32> to vector<16x16x8xf32>
    %63 = vector.shape_cast %60 : vector<16x16x8xf32> to vector<1x16x1x16x8xf32>
    tpu.vector_store %arg6[%c0_61, %c0_62, %c0_63, %c0_64, %c0_65], %63 {strides = array<i32>} : memref<1x16x2x16x8xf32, #tpu.memory_space<vmem>>, vector<1x16x1x16x8xf32>,
    %cst_66 = arith.constant 0.000000e+00 : f32
    %64 = vector.broadcast %cst_66 : f32 to vector<256x4xf32>
    %65 = vector.extract_strided_slice %7 {offsets = [16, 0], sizes = [256, 4], strides = [1, 1]} : vector<288x4xbf16> to vector<256x4xbf16>
    %c2_67 = arith.constant 2 : index
    %c0_68 = arith.constant 0 : index
    %c0_69 = arith.constant 0 : index
    %c0_70 = arith.constant 0 : index
    %66 = vector.load %arg4[%c2_67, %c0_68, %c0_69, %c0_70] : memref<4x4x4x4xbf16, #tpu.memory_space<vmem>>, vector<1x1x4x4xbf16>
    %67 = vector.shape_cast %66 : vector<1x1x4x4xbf16> to vector<4x4xbf16>
    %cst_71 = arith.constant dense<0.000000e+00> : vector<256x4xf32>
    %68 = tpu.matmul %65, %67, %cst_71 {dimension_numbers = #tpu.dot_dimension_numbers<[1], [0], [0], [1], [0, 0, 1, 1], [], []>} : vector<256x4xbf16>, vector<4x4xbf16>, vector<256x4xf32> -> vector<256x4xf32>
    %69 = arith.addf %64, %68 : vector<256x4xf32>
    %70 = vector.extract_strided_slice %9 {offsets = [16, 0], sizes = [256, 4], strides = [1, 1]} : vector<288x4xbf16> to vector<256x4xbf16>
    %c2_72 = arith.constant 2 : index
    %c1_73 = arith.constant 1 : index
    %c0_74 = arith.constant 0 : index
    %c0_75 = arith.constant 0 : index
    %71 = vector.load %arg4[%c2_72, %c1_73, %c0_74, %c0_75] : memref<4x4x4x4xbf16, #tpu.memory_space<vmem>>, vector<1x1x4x4xbf16>
    %72 = vector.shape_cast %71 : vector<1x1x4x4xbf16> to vector<4x4xbf16>
    %cst_76 = arith.constant dense<0.000000e+00> : vector<256x4xf32>
    %73 = tpu.matmul %70, %72, %cst_76 {dimension_numbers = #tpu.dot_dimension_numbers<[1], [0], [0], [1], [0, 0, 1, 1], [], []>} : vector<256x4xbf16>, vector<4x4xbf16>, vector<256x4xf32> -> vector<256x4xf32>
    %74 = arith.addf %69, %73 : vector<256x4xf32>
    %75 = vector.extract_strided_slice %7 {offsets = [32, 0], sizes = [256, 4], strides = [1, 1]} : vector<288x4xbf16> to vector<256x4xbf16>
    %c2_77 = arith.constant 2 : index
    %c2_78 = arith.constant 2 : index
    %c0_79 = arith.constant 0 : index
    %c0_80 = arith.constant 0 : index
    %76 = vector.load %arg4[%c2_77, %c2_78, %c0_79, %c0_80] : memref<4x4x4x4xbf16, #tpu.memory_space<vmem>>, vector<1x1x4x4xbf16>
    %77 = vector.shape_cast %76 : vector<1x1x4x4xbf16> to vector<4x4xbf16>
    %cst_81 = arith.constant dense<0.000000e+00> : vector<256x4xf32>
    %78 = tpu.matmul %75, %77, %cst_81 {dimension_numbers = #tpu.dot_dimension_numbers<[1], [0], [0], [1], [0, 0, 1, 1], [], []>} : vector<256x4xbf16>, vector<4x4xbf16>, vector<256x4xf32> -> vector<256x4xf32>
    %79 = arith.addf %74, %78 : vector<256x4xf32>
    %80 = vector.extract_strided_slice %9 {offsets = [32, 0], sizes = [256, 4], strides = [1, 1]} : vector<288x4xbf16> to vector<256x4xbf16>
    %c2_82 = arith.constant 2 : index
    %c3_83 = arith.constant 3 : index
    %c0_84 = arith.constant 0 : index
    %c0_85 = arith.constant 0 : index
    %81 = vector.load %arg4[%c2_82, %c3_83, %c0_84, %c0_85] : memref<4x4x4x4xbf16, #tpu.memory_space<vmem>>, vector<1x1x4x4xbf16>
    %82 = vector.shape_cast %81 : vector<1x1x4x4xbf16> to vector<4x4xbf16>
    %cst_86 = arith.constant dense<0.000000e+00> : vector<256x4xf32>
    %83 = tpu.matmul %80, %82, %cst_86 {dimension_numbers = #tpu.dot_dimension_numbers<[1], [0], [0], [1], [0, 0, 1, 1], [], []>} : vector<256x4xbf16>, vector<4x4xbf16>, vector<256x4xf32> -> vector<256x4xf32>
    %84 = arith.addf %79, %83 : vector<256x4xf32>
    %85 = vector.shape_cast %84 : vector<256x4xf32> to vector<16x16x4xf32>
    %cst_87 = arith.constant 0.000000e+00 : f32
    %86 = vector.broadcast %cst_87 : f32 to vector<256x4xf32>
    %87 = vector.extract_strided_slice %9 {offsets = [16, 0], sizes = [256, 4], strides = [1, 1]} : vector<288x4xbf16> to vector<256x4xbf16>
    %c3_88 = arith.constant 3 : index
    %c0_89 = arith.constant 0 : index
    %c0_90 = arith.constant 0 : index
    %c0_91 = arith.constant 0 : index
    %88 = vector.load %arg4[%c3_88, %c0_89, %c0_90, %c0_91] : memref<4x4x4x4xbf16, #tpu.memory_space<vmem>>, vector<1x1x4x4xbf16>
    %89 = vector.shape_cast %88 : vector<1x1x4x4xbf16> to vector<4x4xbf16>
    %cst_92 = arith.constant dense<0.000000e+00> : vector<256x4xf32>
    %90 = tpu.matmul %87, %89, %cst_92 {dimension_numbers = #tpu.dot_dimension_numbers<[1], [0], [0], [1], [0, 0, 1, 1], [], []>} : vector<256x4xbf16>, vector<4x4xbf16>, vector<256x4xf32> -> vector<256x4xf32>
    %91 = arith.addf %86, %90 : vector<256x4xf32>
    %92 = vector.extract_strided_slice %11 {offsets = [16, 0], sizes = [256, 4], strides = [1, 1]} : vector<288x4xbf16> to vector<256x4xbf16>
    %c3_93 = arith.constant 3 : index
    %c1_94 = arith.constant 1 : index
    %c0_95 = arith.constant 0 : index
    %c0_96 = arith.constant 0 : index
    %93 = vector.load %arg4[%c3_93, %c1_94, %c0_95, %c0_96] : memref<4x4x4x4xbf16, #tpu.memory_space<vmem>>, vector<1x1x4x4xbf16>
    %94 = vector.shape_cast %93 : vector<1x1x4x4xbf16> to vector<4x4xbf16>
    %cst_97 = arith.constant dense<0.000000e+00> : vector<256x4xf32>
    %95 = tpu.matmul %92, %94, %cst_97 {dimension_numbers = #tpu.dot_dimension_numbers<[1], [0], [0], [1], [0, 0, 1, 1], [], []>} : vector<256x4xbf16>, vector<4x4xbf16>, vector<256x4xf32> -> vector<256x4xf32>
    %96 = arith.addf %91, %95 : vector<256x4xf32>
    %97 = vector.extract_strided_slice %9 {offsets = [32, 0], sizes = [256, 4], strides = [1, 1]} : vector<288x4xbf16> to vector<256x4xbf16>
    %c3_98 = arith.constant 3 : index
    %c2_99 = arith.constant 2 : index
    %c0_100 = arith.constant 0 : index
    %c0_101 = arith.constant 0 : index
    %98 = vector.load %arg4[%c3_98, %c2_99, %c0_100, %c0_101] : memref<4x4x4x4xbf16, #tpu.memory_space<vmem>>, vector<1x1x4x4xbf16>
    %99 = vector.shape_cast %98 : vector<1x1x4x4xbf16> to vector<4x4xbf16>
    %cst_102 = arith.constant dense<0.000000e+00> : vector<256x4xf32>
    %100 = tpu.matmul %97, %99, %cst_102 {dimension_numbers = #tpu.dot_dimension_numbers<[1], [0], [0], [1], [0, 0, 1, 1], [], []>} : vector<256x4xbf16>, vector<4x4xbf16>, vector<256x4xf32> -> vector<256x4xf32>
    %101 = arith.addf %96, %100 : vector<256x4xf32>
    %102 = vector.extract_strided_slice %11 {offsets = [32, 0], sizes = [256, 4], strides = [1, 1]} : vector<288x4xbf16> to vector<256x4xbf16>
    %c3_103 = arith.constant 3 : index
    %c3_104 = arith.constant 3 : index
    %c0_105 = arith.constant 0 : index
    %c0_106 = arith.constant 0 : index
    %103 = vector.load %arg4[%c3_103, %c3_104, %c0_105, %c0_106] : memref<4x4x4x4xbf16, #tpu.memory_space<vmem>>, vector<1x1x4x4xbf16>
    %104 = vector.shape_cast %103 : vector<1x1x4x4xbf16> to vector<4x4xbf16>
    %cst_107 = arith.constant dense<0.000000e+00> : vector<256x4xf32>
    %105 = tpu.matmul %102, %104, %cst_107 {dimension_numbers = #tpu.dot_dimension_numbers<[1], [0], [0], [1], [0, 0, 1, 1], [], []>} : vector<256x4xbf16>, vector<4x4xbf16>, vector<256x4xf32> -> vector<256x4xf32>
    %106 = arith.addf %101, %105 : vector<256x4xf32>
    %107 = vector.shape_cast %106 : vector<256x4xf32> to vector<16x16x4xf32>
    %108 = tpu.concatenate %85, %107 in 2 : vector<16x16x4xf32>, vector<16x16x4xf32> -> vector<16x16x8xf32>
    %109 = vector.shape_cast %12 : vector<1x8xf32> to vector<1x1x8xf32>
    %110 = vector.broadcast %109 : vector<1x1x8xf32> to vector<16x16x8xf32>
    %111 = arith.addf %108, %110 : vector<16x16x8xf32>
    %c0_108 = arith.constant 0 : index
    %c0_109 = arith.constant 0 : index
    %c1_110 = arith.constant 1 : index
    %c0_111 = arith.constant 0 : index
    %c0_112 = arith.constant 0 : index
    %112 = vector.load %arg6[%c0_108, %c0_109, %c1_110, %c0_111, %c0_112] : memref<1x16x2x16x8xf32, #tpu.memory_space<vmem>>, vector<1x16x1x16x8xf32>
    %113 = vector.shape_cast %112 : vector<1x16x1x16x8xf32> to vector<16x16x8xf32>
    %114 = vector.shape_cast %111 : vector<16x16x8xf32> to vector<1x16x1x16x8xf32>
    tpu.vector_store %arg6[%c0_108, %c0_109, %c1_110, %c0_111, %c0_112], %114 {strides = array<i32>} : memref<1x16x2x16x8xf32, #tpu.memory_space<vmem>>, vector<1x16x1x16x8xf32>,
    return
  }
  func.func @transform_0(%arg0: i32, %arg1: i32) -> (i32, i32, i32, i32) {
    %c0_i32 = arith.constant 0 : i32
    %c0_i32_0 = arith.constant 0 : i32
    %c0_i32_1 = arith.constant 0 : i32
    return %arg0, %arg1, %c0_i32, %c0_i32_0 : i32, i32, i32, i32
  }
  func.func @transform_1(%arg0: i32, %arg1: i32) -> (i32, i32, i32, i32) {
    %c0_i32 = arith.constant 0 : i32
    %c0_i32_0 = arith.constant 0 : i32
    %c0_i32_1 = arith.constant 0 : i32
    return %arg0, %arg1, %c0_i32, %c0_i32_0 : i32, i32, i32, i32
  }
  func.func @transform_2(%arg0: i32, %arg1: i32) -> (i32, i32, i32, i32) {
    %c0_i32 = arith.constant 0 : i32
    %c0_i32_0 = arith.constant 0 : i32
    %c0_i32_1 = arith.constant 0 : i32
    %c0_i32_2 = arith.constant 0 : i32
    %c0_i32_3 = arith.constant 0 : i32
    return %c0_i32, %c0_i32_0, %c0_i32_1, %c0_i32_2 : i32, i32, i32, i32
  }
  func.func @transform_3(%arg0: i32, %arg1: i32) -> (i32, i32) {
    %c0_i32 = arith.constant 0 : i32
    %c0_i32_0 = arith.constant 0 : i32
    %c0_i32_1 = arith.constant 0 : i32
    return %c0_i32, %c0_i32_0 : i32, i32
  }
  func.func @transform_4(%arg0: i32, %arg1: i32) -> (i32, i32, i32, i32, i32) {
    %c0_i32 = arith.constant 0 : i32
    %c0_i32_0 = arith.constant 0 : i32
    %c0_i32_1 = arith.constant 0 : i32
    %c0_i32_2 = arith.constant 0 : i32
    return %arg0, %arg1, %c0_i32, %c0_i32_0, %c0_i32_1 : i32, i32, i32, i32, i32
  }
}

</mosaic_0001>

<bundles_post_ra>
// kernel: _lambda_.1
= control target key start
LH: loop header
LB: loop body
LE: loop exit
PB: predicated region body
PF: predicated region fallthrough
CT: control target
= control target key end

     0   :  { %s6602_s15 = smov 0   ;;  %s6604_s16 = smov 0   ;;  %s8292_s0 = inlined_call_operand.vmem [shape: bf16[2,16,18,4], index: 0, kind: input, shape index: {}]   ;;  %s8293_s1 = inlined_call_operand.vmem [shape: bf16[2,2,18,4], index: 1, kind: input, shape index: {}]   ;;  %s8294_s2 = inlined_call_operand.vmem [shape: bf16[4,4,4,4], index: 2, kind: input, shape index: {}]   ;;  %s8295_s3 = inlined_call_operand.vmem [shape: f32[1,8], index: 3, kind: input, shape index: {}]   ;;  %s8296_s4 = inlined_call_operand.vmem [shape: f32[2,16,2,16,8], index: 4, kind: output, shape index: {}]  }
   0x1   :  { %s6606_s17 = smov 0  }
   0x2 LB: > { %s26_s18 = sadd.s32 1, %s6570_s16  ;;  %p4916_p0 = scmp.ge.s32.totalorder %s6574_s17, 1  ;;  %s6574_s17 = sphi %s6606_s17, %s14_s17   ;;  %s6570_s16 = sphi %s6604_s16, %s8376_s16   ;;  %s6566_s15 = sphi %s6602_s15, %s8375_s15  }
   0x3   : > { %p28_p1 = scmp.ge.s32.totalorder %s26_s18, 2  ;;  %p202_p2 = scmp.lt.s32.totalorder %s6574_s17, 3 }
   0x5   : > { %s8378_s18 = smov (%p28_p1, %s26_s18), 0  ;;  %p203_p3 = pnand %p4916_p0, %p202_p2 }
   0x7   : > { %206 = sbr.rel (%p203_p3) target bundleno = 925 (0x39d), region = 36 }
   0xe   : > { %vm1184_vm0 = vcmask 1041408   ;;  %v5041_v0 = vld [vmem:[%s8294_s2 + $0xa] sm:$0x3]  ;;  %p249_p4 = scmp.lt.s32.totalorder %s6566_s15, 1  ;;  %v5040_v2 = vld [vmem:[%s8294_s2 + $0x8] sm:$0x3] }
   0xf   : > { %6504 = vmatprep.subr.msk.bf16.mxu1 %vm1184_vm0, %v5041_v0  ;;  %v2135_v1 = vsel %vm1184_vm0, %v5041_v0, 0  ;;  %v4939_v3 = vld [vmem:[%s8294_s2 + $0x2] sm:$0x3]  ;;  %vm954_vm1 = vcmask 1042432   ;;  %vm955_vm2 = vcmask 1046532   ;;  %vm330_vm3 = vcmask 27648  }
  0x10   : > { %5709 = vmatpush3.bf16.msra.mxu1 %v2135_v1  ;;  %s8380_s15 = smov (!%p249_p4, %s6566_s15), 1  ;;  %6500 = vmatprep.subr.msk.bf16.mxu0 %vm1184_vm0, %v4939_v3  ;;  %v1186_v4 = vsel %vm1184_vm0, %v4939_v3, 0  ;;  %v1084_v5 = vld [vmem:[%s8294_s2] sm:$0x3]  ;;  %vm333_vm4 = vcmask 24576   ;;  %v6647_v6 = vsel %vm1184_vm0, %v5040_v2, 0  ;;  %vm6655_vm5 = vmor %vm954_vm1, %vm955_vm2 }
  0x11   : > { %6505 = vmatprep.subr.msk.bf16.mxu1 %vm1184_vm0, %v5040_v2  ;;  %s6516_s25 = smul.u32 192, %s8380_s15  ;;  %5573 = vmatpush3.bf16.msra.mxu0 %v1186_v4  ;;  %v6650_v7 = vsel %vm1184_vm0, %v1084_v5, 0  ;;  %vm1135_vm6 = vcmask 31744   ;;  %vm447_vm7 = vsmask.f32 3328  ;;  %s6576_s11 = smov 4  }
  0x12   : > { %6501 = vmatprep.subr.msk.bf16.mxu0 %vm1184_vm0, %v1084_v5  ;;  %vm448_vm8 = vsmask.f32 7440  ;;  %s6517_s9 = smul.u32 24, %s8380_s15  ;;  %vm3062_vm10 = vcmask 64512  }
  0x13   : > { %s6644_s30 = scalar_lea.vmem %s8292_s0, %s6516_s25  ;;  %vm6720_vm9 = vmor %vm447_vm7, %vm448_vm8 }
  0x14   : > { %v282_v8 = vld [vmem:[%s6644_s30] sm:$0xf]  ;;  %v283_v9 = vld [vmem:[%s6644_s30 + $0x4] sm:$0xf]  ;;  %v284_v10 = vld [vmem:[%s6644_s30 + $0x8] sm:$0x1]  ;;  %s7081_s12 = scalar_lea.vmem %s8293_s1, %s6517_s9 }
  0x15   : > { %331 = vst.msk [vmem:[#allocation2] sm:$0xf] %vm330_vm3, %v282_v8  ;;  %332 = vst.msk [vmem:[#allocation2 + $0x4] sm:$0xf] %vm330_vm3, %v283_v9  ;;  %v285_v12 = vld [vmem:[%s6644_s30 + $0xc] sm:$0xf] }
  0x16   : > { %334 = vst.msk [vmem:[#allocation2 + $0x8] sm:$0x1] %vm333_vm4, %v284_v10  ;;  %v286_v13 = vld [vmem:[%s6644_s30 + $0x10] sm:$0xf]  ;;  %v287_v14 = vld [vmem:[%s6644_s30 + $0x14] sm:$0x1] }
  0x17   : > { %335 = vst.msk [vmem:[#allocation2 + $0xc] sm:$0xf] %vm330_vm3, %v285_v12  ;;  %336 = vst.msk [vmem:[#allocation2 + $0x10] sm:$0xf] %vm330_vm3, %v286_v13  ;;  %v288_v15 = vld [vmem:[%s6644_s30 + $0x18] sm:$0xf] }
  0x18   : > { %337 = vst.msk [vmem:[#allocation2 + $0x14] sm:$0x1] %vm333_vm4, %v287_v14  ;;  %v289_v16 = vld [vmem:[%s6644_s30 + $0x1c] sm:$0xf]  ;;  %v290_v17 = vld [vmem:[%s6644_s30 + $0x20] sm:$0x1] }
  0x19   : > { %338 = vst.msk [vmem:[#allocation2 + $0x18] sm:$0xf] %vm330_vm3, %v288_v15  ;;  %339 = vst.msk [vmem:[#allocation2 + $0x1c] sm:$0xf] %vm330_vm3, %v289_v16  ;;  %v291_v18 = vld [vmem:[%s6644_s30 + $0x24] sm:$0xf] }
  0x1a   : > { %340 = vst.msk [vmem:[#allocation2 + $0x20] sm:$0x1] %vm333_vm4, %v290_v17  ;;  %v292_v19 = vld [vmem:[%s6644_s30 + $0x28] sm:$0xf]  ;;  %v293_v20 = vld [vmem:[%s6644_s30 + $0x2c] sm:$0x1] }
  0x1b   : > { %341 = vst.msk [vmem:[#allocation2 + $0x24] sm:$0xf] %vm330_vm3, %v291_v18  ;;  %342 = vst.msk [vmem:[#allocation2 + $0x28] sm:$0xf] %vm330_vm3, %v292_v19  ;;  %v294_v21 = vld [vmem:[%s6644_s30 + $0x30] sm:$0xf] }
  0x1c   : > { %343 = vst.msk [vmem:[#allocation2 + $0x2c] sm:$0x1] %vm333_vm4, %v293_v20  ;;  %v295_v22 = vld [vmem:[%s6644_s30 + $0x34] sm:$0xf]  ;;  %v296_v23 = vld [vmem:[%s6644_s30 + $0x38] sm:$0x1] }
  0x1d   : > { %344 = vst.msk [vmem:[#allocation2 + $0x30] sm:$0xf] %vm330_vm3, %v294_v21  ;;  %345 = vst.msk [vmem:[#allocation2 + $0x34] sm:$0xf] %vm330_vm3, %v295_v22  ;;  %v297_v24 = vld [vmem:[%s6644_s30 + $0x3c] sm:$0xf] }
  0x1e   : > { %346 = vst.msk [vmem:[#allocation2 + $0x38] sm:$0x1] %vm333_vm4, %v296_v23  ;;  %v298_v25 = vld [vmem:[%s6644_s30 + $0x40] sm:$0xf]  ;;  %v299_v26 = vld [vmem:[%s6644_s30 + $0x44] sm:$0x1] }
  0x1f   : > { %347 = vst.msk [vmem:[#allocation2 + $0x3c] sm:$0xf] %vm330_vm3, %v297_v24  ;;  %348 = vst.msk [vmem:[#allocation2 + $0x40] sm:$0xf] %vm330_vm3, %v298_v25  ;;  %v300_v27 = vld [vmem:[%s6644_s30 + $0x48] sm:$0xf] }
  0x20   : > { %349 = vst.msk [vmem:[#allocation2 + $0x44] sm:$0x1] %vm333_vm4, %v299_v26  ;;  %v301_v28 = vld [vmem:[%s6644_s30 + $0x4c] sm:$0xf]  ;;  %v302_v29 = vld [vmem:[%s6644_s30 + $0x50] sm:$0x1] }
  0x21   : > { %350 = vst.msk [vmem:[#allocation2 + $0x48] sm:$0xf] %vm330_vm3, %v300_v27  ;;  %351 = vst.msk [vmem:[#allocation2 + $0x4c] sm:$0xf] %vm330_vm3, %v301_v28  ;;  %v303_v30 = vld [vmem:[%s6644_s30 + $0x54] sm:$0xf] }
  0x22   : > { %352 = vst.msk [vmem:[#allocation2 + $0x50] sm:$0x1] %vm333_vm4, %v302_v29  ;;  %v304_v31 = vld [vmem:[%s6644_s30 + $0x58] sm:$0xf]  ;;  %v305_v32 = vld [vmem:[%s6644_s30 + $0x5c] sm:$0x1] }
  0x23   : > { %v394_v33 = vld [vmem:[#allocation2 + $0x4] sm:$0xf]  ;;  %v429_v34 = vld [vmem:[#allocation2 + $0x8] sm:$0x1]  ;;  %v882_v35 = vld [vmem:[#allocation2] sm:$0xe] }
  0x24   : > { %353 = vst.msk [vmem:[#allocation2 + $0x54] sm:$0xf] %vm330_vm3, %v303_v30  ;;  %354 = vst.msk [vmem:[#allocation2 + $0x58] sm:$0xf] %vm330_vm3, %v304_v31  ;;  %v4921_v36 = vrot.slane %v882_v35, 9  ;;  %v959_v37 = vrot.slane %v394_v33, 5 }
  0x25   : > { %355 = vst.msk [vmem:[#allocation2 + $0x5c] sm:$0x1] %vm333_vm4, %v305_v32  ;;  %v962_v38 = vrot.slane %v429_v34, 5  ;;  %v396_v39 = vld [vmem:[#allocation2 + $0x10] sm:$0xf]  ;;  %v460_v40 = vshll.u32 %v394_v33, 16 }
  0x26   : > { %v430_v41 = vld [vmem:[#allocation2 + $0x14] sm:$0x1]  ;;  %v484_v42 = vshll.u32 %v396_v39, 16  ;;  %v488_v43 = vshrl.u32 %v396_v39, 16  ;;  %v883_v44 = vld [vmem:[#allocation2 + $0xc] sm:$0xe]  ;;  %v960_v45 = vsel %vm6655_vm5, %v4921_v36, %v959_v37 }
  0x27   : > { %v961_v46 = vrot.slane %v959_v37, 4  ;;  %v494_v47 = vshll.u32 %v430_v41, 16  ;;  %v4922_v48 = vrot.slane %v883_v44, 9  ;;  %v393_v49 = vld [vmem:[#allocation2] sm:$0xf]  ;;  %v966_v52 = vrot.slane %v396_v39, 5 }
  0x28   : > { %v6706_v50 = vrot.slane %v484_v42, 5  ;;  %v490_v51 = vrot.slane %v488_v43, 4  ;;  %v969_v53 = vrot.slane %v430_v41, 5  ;;  %v451_v56 = vshrl.u32 %v393_v49, 16  ;;  %v395_v58 = vld [vmem:[#allocation2 + $0xc] sm:$0xf] }
  0x29   : > { %v963_v54 = vsel %vm6655_vm5, %v961_v46, %v962_v38  ;;  %v496_v55 = vrot.slane %v494_v47, 5  ;;  %v454_v57 = vshll.u32 %v393_v49, 16  ;;  %v967_v60 = vsel %vm6655_vm5, %v4922_v48, %v966_v52  ;;  %v397_v3 = vld [vmem:[#allocation2 + $0x18] sm:$0xf]  ;;  %v398_v10 = vld [vmem:[#allocation2 + $0x1c] sm:$0xf] }
  0x2a   : > { %v5042_v59 = vcombine.low %v960_v45, %v963_v54  ;;  %v968_v61 = vrot.slane %v966_v52, 4  ;;  %v462_v62 = vrot.slane %v460_v40, 5  ;;  %v453_v63 = vrot.slane %v451_v56, 4  ;;  %v6727_v21 = vld [vmem:[%s8294_s2 + $0xc] sm:$0x3] }
  0x2b   : > { %v456_v0 = vrot.slane %v454_v57, 5  ;;  %v464_v1 = vshrl.u32 %v394_v33, 16  ;;  %v470_v2 = vshll.u32 %v429_v34, 16  ;;  %v475_v5 = vshrl.u32 %v395_v58, 16  ;;  %v884_v26 = vld [vmem:[#allocation2 + $0x18] sm:$0xe] }
  0x2c   : > { %5710 = vmatprep.mubr.msk.bf16.mxu1 %vm1135_vm6, %v5042_v59  ;;  %v970_v4 = vsel %vm6655_vm5, %v968_v61, %v969_v53  ;;  %v478_v8 = vshll.u32 %v395_v58, 16  ;;  %v491_v9 = vor.u32 %v490_v51, %v6706_v50  ;;  %v499_v20 = vshrl.u32 %v397_v3, 16  ;;  %v431_v29 = vld [vmem:[#allocation2 + $0x20] sm:$0x1]  ;;  %v6740_v43 = vld [vmem:[#allocation2 + $0x24] sm:$0xf] }
  0x2d   : > { %v6716_v12 = vcombine.low %v967_v60, %v970_v4  ;;  %v457_v14 = vor.u32 %v456_v0, %v453_v63  ;;  %v466_v15 = vrot.slane %v464_v1, 4  ;;  %v472_v16 = vrot.slane %v470_v2, 5  ;;  %v6742_v44 = vld [vmem:[#allocation2 + $0x28] sm:$0xf]  ;;  %v6765_v63 = vld [vmem:[#allocation2 + $0x30] sm:$0xf] }
  0x2e   : > { %v477_v17 = vrot.slane %v475_v5, 4  ;;  %v480_v18 = vrot.slane %v478_v8, 5  ;;  %v492_v19 = vrot.slane %v491_v9, 4  ;;  %v502_v24 = vshll.u32 %v397_v3, 16  ;;  %v6771_v4 = vld [vmem:[#allocation2 + $0x34] sm:$0xf] }
  0x2f   : > { %8335 = vst [vmem:[#allocation3_spill] sm:$0xff] %v6716_v12  ;;  %5711 = vmatmul.mubr.msk.bf16.vlgmr.msra.gmra.mrb[0].mxu1 %vm1135_vm6, %v6716_v12  ;;  %v458_v22 = vrot.slane %v457_v14, 4  ;;  %v467_v23 = vor.u32 %v466_v15, %v462_v62  ;;  %v508_v25 = vshll.u32 %v398_v10, 16  ;;  %v501_v30 = vrot.slane %v499_v20, 4  ;;  %v306_v5 = vld [vmem:[%s6644_s30 + $0x60] sm:$0xf] }
  0x30   : > { %5743 = vmatpush3.bf16.msra.mxu1 %v6647_v6  ;;  %v481_v27 = vor.u32 %v480_v18, %v477_v17  ;;  %v497_v28 = vsel %vm6720_vm9, %v492_v19, %v496_v55  ;;  %v512_v31 = vshrl.u32 %v398_v10, 16  ;;  %v504_v34 = vrot.slane %v502_v24, 5  ;;  %v432_v55 = vld [vmem:[#allocation2 + $0x2c] sm:$0x1]  ;;  %v307_v15 = vld [vmem:[%s6644_s30 + $0x64] sm:$0xf] }
  0x31   : > { %v463_v32 = vsel %vm6720_vm9, %v458_v22, %v462_v62  ;;  %v468_v33 = vrot.slane %v467_v23, 4  ;;  %v510_v35 = vrot.slane %v508_v25, 5  ;;  %6506 = vmatprep.subr.msk.bf16.mxu1 %vm1184_vm0, %v6727_v21  ;;  %v518_v38 = vshll.u32 %v431_v29, 16  ;;  %v885_v62 = vld [vmem:[#allocation2 + $0x24] sm:$0xe] }
  0x32   : > { %v482_v36 = vrot.slane %v481_v27, 4  ;;  %v514_v37 = vrot.slane %v512_v31, 4  ;;  %v4923_v6 = vrot.slane %v884_v26, 9  ;;  %v505_v40 = vor.u32 %v504_v34, %v501_v30  ;;  %356 = vst.msk [vmem:[#allocation2 + $0x60] sm:$0xf] %vm330_vm3, %v306_v5 }
  0x33   : > { %v473_v39 = vsel %vm6720_vm9, %v468_v33, %v472_v16  ;;  %v973_v41 = vrot.slane %v398_v10, 5  ;;  %v976_v42 = vrot.slane %v431_v29, 5  ;;  %v520_v48 = vrot.slane %v518_v38, 5  ;;  %v886_v20 = vld [vmem:[#allocation2 + $0x30] sm:$0xe] }
  0x34   : > { %v6744_v45 = vcombine.low %v463_v32, %v473_v39  ;;  %v487_v46 = vsel %vm6720_vm9, %v482_v36, %v6706_v50  ;;  %v515_v47 = vor.u32 %v514_v37, %v510_v35  ;;  %v506_v51 = vrot.slane %v505_v40, 4  ;;  %357 = vst.msk [vmem:[#allocation2 + $0x64] sm:$0xf] %vm330_vm3, %v307_v15  ;;  %v433_v23 = vld [vmem:[#allocation2 + $0x38] sm:$0x1] }
  0x35   : > { %v6749_v49 = vcombine.low %v487_v46, %v497_v28  ;;  %v974_v52 = vsel %vm6655_vm5, %v4923_v6, %v973_v41  ;;  %v975_v53 = vrot.slane %v973_v41, 4  ;;  %v523_v56 = vshrl.u32 %v6740_v43, 16  ;;  %v309_v27 = vld [vmem:[%s6644_s30 + $0x6c] sm:$0xf]  ;;  %v6794_v32 = vld [vmem:[#allocation2 + $0x3c] sm:$0xf] }
  0x36   : > { %5574 = vmatprep.mubr.msk.bf16.mxu0 %vm1135_vm6, %v6744_v45  ;;  %v516_v54 = vrot.slane %v515_v47, 4  ;;  %v526_v57 = vshll.u32 %v6740_v43, 16  ;;  %v532_v50 = vshll.u32 %v6742_v44, 16  ;;  %v511_v58 = vsel %vm6720_vm9, %v506_v51, %v510_v35  ;;  %v310_v33 = vld [vmem:[%s6644_s30 + $0x70] sm:$0xf] }
  0x37   : > { %5575 = vmatmul.mubr.msk.bf16.vlgmr.msra.gmra.mrb[0].mxu0 %vm1135_vm6, %v6749_v49  ;;  %v977_v59 = vsel %vm6655_vm5, %v975_v53, %v976_v42  ;;  %v536_v60 = vshrl.u32 %v6742_v44, 16  ;;  %v542_v61 = vshll.u32 %v432_v55, 16  ;;  %v525_v2 = vrot.slane %v523_v56, 4  ;;  %359 = vst.msk [vmem:[#allocation2 + $0x6c] sm:$0xf] %vm330_vm3, %v309_v27 }
  0x38   : > { %v521_v0 = vsel %vm6720_vm9, %v516_v54, %v520_v48  ;;  %v6769_v1 = vcombine.low %v974_v52, %v977_v59  ;;  %v528_v3 = vrot.slane %v526_v57, 5  ;;  %5607 = vmatpush3.bf16.msra.mxu0 %v6650_v7  ;;  %v534_v9 = vrot.slane %v532_v50, 5  ;;  %v308_v7 = vld [vmem:[%s6644_s30 + $0x68] sm:$0x1]  ;;  %v6798_v38 = vld [vmem:[#allocation2 + $0x40] sm:$0xf] }
  0x39   : > { %v6775_v8 = vcombine.low %v511_v58, %v521_v0  ;;  %v538_v10 = vrot.slane %v536_v60, 4  ;;  %v544_v14 = vrot.slane %v542_v61, 5  ;;  %v4924_v17 = vrot.slane %v885_v62, 9  ;;  %358 = vst.msk [vmem:[#allocation2 + $0x68] sm:$0x1] %vm333_vm4, %v308_v7 }
  0x3a   : > { %8338 = vst [vmem:[#allocation4_spill] sm:$0xff] %v6769_v1  ;;  %5714 = vmatprep.mubr.msk.bf16.mxu1 %vm1135_vm6, %v6769_v1  ;;  %v529_v16 = vor.u32 %v528_v3, %v525_v2  ;;  %v980_v18 = vrot.slane %v6742_v44, 5  ;;  %v983_v19 = vrot.slane %v432_v55, 5  ;;  %v547_v24 = vshrl.u32 %v6765_v63, 16  ;;  %v311_v6 = vld [vmem:[%s6644_s30 + $0x74] sm:$0x1] }
  0x3b   : > { %v539_v22 = vor.u32 %v538_v10, %v534_v9  ;;  %5578 = vmatprep.mubr.msk.bf16.mxu0 %vm1135_vm6, %v6775_v8  ;;  %v550_v25 = vshll.u32 %v6765_v63, 16  ;;  %v556_v26 = vshll.u32 %v6771_v4, 16  ;;  %v560_v31 = vshrl.u32 %v6771_v4, 16  ;;  %360 = vst.msk [vmem:[#allocation2 + $0x70] sm:$0xf] %vm330_vm3, %v310_v33 }
  0x3c   : > { %v530_v28 = vrot.slane %v529_v16, 4  ;;  %v981_v29 = vsel %vm6655_vm5, %v4924_v17, %v980_v18  ;;  %v982_v30 = vrot.slane %v980_v18, 4  ;;  %v549_v35 = vrot.slane %v547_v24, 4  ;;  %361 = vst.msk [vmem:[#allocation2 + $0x74] sm:$0x1] %vm333_vm4, %v311_v6 }
  0x3d   : > { %v540_v34 = vrot.slane %v539_v22, 4  ;;  %v552_v36 = vrot.slane %v550_v25, 5  ;;  %v558_v37 = vrot.slane %v556_v26, 5  ;;  %v562_v41 = vrot.slane %v560_v31, 4  ;;  %v312_v46 = vld [vmem:[%s6644_s30 + $0x78] sm:$0xf] }
  0x3e   : > { %v535_v39 = vsel %vm6720_vm9, %v530_v28, %v534_v9  ;;  %v984_v40 = vsel %vm6655_vm5, %v982_v30, %v983_v19  ;;  %v566_v42 = vshll.u32 %v433_v23, 16  ;;  %v313_v47 = vld [vmem:[%s6644_s30 + $0x7c] sm:$0xf]  ;;  %v4925_v53 = vrot.slane %v886_v20, 9  ;;  %v314_v54 = vld [vmem:[%s6644_s30 + $0x80] sm:$0x1] }
  0x3f   : > { %v545_v48 = vsel %vm6720_vm9, %v540_v34, %v544_v14  ;;  %v6811_v51 = vcombine.low %v981_v29, %v984_v40  ;;  %v553_v52 = vor.u32 %v552_v36, %v549_v35  ;;  %362 = vst.msk [vmem:[#allocation2 + $0x78] sm:$0xf] %vm330_vm3, %v312_v46  ;;  %363 = vst.msk [vmem:[#allocation2 + $0x7c] sm:$0xf] %vm330_vm3, %v313_v47  ;;  %v315_v55 = vld [vmem:[%s6644_s30 + $0x84] sm:$0xf] }
  0x40   : > { %v6817_v56 = vcombine.low %v535_v39, %v545_v48  ;;  %v563_v57 = vor.u32 %v562_v41, %v558_v37  ;;  %v568_v50 = vrot.slane %v566_v42, 5  ;;  %v987_v58 = vrot.slane %v6771_v4, 5  ;;  %364 = vst.msk [vmem:[#allocation2 + $0x80] sm:$0x1] %vm333_vm4, %v314_v54  ;;  %v434_v5 = vld [vmem:[#allocation2 + $0x44] sm:$0x1] }
  0x41   : > { %8339 = vst [vmem:[#allocation5_spill] sm:$0xff] %v6811_v51  ;;  %365 = vst.msk [vmem:[#allocation2 + $0x84] sm:$0xf] %vm330_vm3, %v315_v55  ;;  %5715 = vmatmul.mubr.msk.bf16.gmra.mrb[4].mxu1 %vm1135_vm6, %v6811_v51  ;;  %v554_v59 = vrot.slane %v553_v52, 4  ;;  %v990_v60 = vrot.slane %v433_v23, 5  ;;  %v571_v61 = vshrl.u32 %v6794_v32, 16 }
  0x42   : > { %v574_v62 = vshll.u32 %v6794_v32, 16  ;;  %5579 = vmatmul.mubr.msk.bf16.gmra.mrb[4].mxu0 %vm1135_vm6, %v6817_v56  ;;  %v564_v0 = vrot.slane %v563_v57, 4  ;;  %v988_v2 = vsel %vm6655_vm5, %v4925_v53, %v987_v58  ;;  %v989_v3 = vrot.slane %v987_v58, 4  ;;  %v887_v17 = vld [vmem:[#allocation2 + $0x3c] sm:$0xe] }
  0x43   : > { %v580_v9 = vshll.u32 %v6798_v38, 16  ;;  %v559_v10 = vsel %vm6720_vm9, %v554_v59, %v558_v37  ;;  %v573_v14 = vrot.slane %v571_v61, 4  ;;  %v584_v16 = vshrl.u32 %v6798_v38, 16  ;;  %v6838_v22 = vld [vmem:[#allocation2 + $0x48] sm:$0xf] }
  0x44   : > { %v576_v15 = vrot.slane %v574_v62, 5  ;;  %v569_v18 = vsel %vm6720_vm9, %v564_v0, %v568_v50  ;;  %v991_v19 = vsel %vm6655_vm5, %v989_v3, %v990_v60  ;;  %v590_v7 = vshll.u32 %v434_v5, 16  ;;  %v6844_v27 = vld [vmem:[#allocation2 + $0x4c] sm:$0xf]  ;;  %v316_v28 = vld [vmem:[%s6644_s30 + $0x88] sm:$0xf] }
  0x45   : > { %v582_v20 = vrot.slane %v580_v9, 5  ;;  %v6840_v23 = vcombine.low %v559_v10, %v569_v18  ;;  %v6842_v24 = vcombine.low %v988_v2, %v991_v19  ;;  %v586_v26 = vrot.slane %v584_v16, 4  ;;  %366 = vst.msk [vmem:[#allocation2 + $0x88] sm:$0xf] %vm330_vm3, %v316_v28  ;;  %v435_v36 = vld [vmem:[#allocation2 + $0x50] sm:$0x1] }
  0x46   : > { %v577_v25 = vor.u32 %v576_v15, %v573_v14  ;;  %v592_v29 = vrot.slane %v590_v7, 5  ;;  %v4926_v30 = vrot.slane %v887_v17, 9  ;;  %v994_v31 = vrot.slane %v6798_v38, 5  ;;  %v888_v46 = vld [vmem:[#allocation2 + $0x48] sm:$0xe] }
  0x47   : > { %8340 = vst [vmem:[#allocation6_spill] sm:$0xff] %v6842_v24  ;;  %v997_v33 = vrot.slane %v434_v5, 5  ;;  %5718 = vmatprep.mubr.msk.bf16.mxu1 %vm1135_vm6, %v6842_v24  ;;  %v587_v35 = vor.u32 %v586_v26, %v582_v20  ;;  %5582 = vmatprep.mubr.msk.bf16.mxu0 %vm1135_vm6, %v6840_v23  ;;  %v595_v37 = vshrl.u32 %v6838_v22, 16  ;;  %v598_v6 = vshll.u32 %v6838_v22, 16  ;;  %v6861_v54 = vld [vmem:[#allocation2 + $0x54] sm:$0xf] }
  0x48   : > { %v578_v34 = vrot.slane %v577_v25, 4  ;;  %v995_v39 = vsel %vm6655_vm5, %v4926_v30, %v994_v31  ;;  %v996_v40 = vrot.slane %v994_v31, 4  ;;  %v604_v41 = vshll.u32 %v6844_v27, 16  ;;  %v317_v59 = vld [vmem:[%s6644_s30 + $0x8c] sm:$0x1] }
  0x49   : > { %v608_v42 = vshrl.u32 %v6844_v27, 16  ;;  %v588_v48 = vrot.slane %v587_v35, 4  ;;  %v597_v52 = vrot.slane %v595_v37, 4  ;;  %v600_v53 = vrot.slane %v598_v6, 5  ;;  %v6870_v2 = vld [vmem:[#allocation2 + $0x58] sm:$0xf] }
  0x4a   : > { %v583_v47 = vsel %vm6720_vm9, %v578_v34, %v582_v20  ;;  %v998_v55 = vsel %vm6655_vm5, %v996_v40, %v997_v33  ;;  %v606_v57 = vrot.slane %v604_v41, 5  ;;  %v614_v58 = vshll.u32 %v435_v36, 16  ;;  %367 = vst.msk [vmem:[#allocation2 + $0x8c] sm:$0x1] %vm333_vm4, %v317_v59  ;;  %v318_v14 = vld [vmem:[%s6644_s30 + $0x90] sm:$0xf] }
  0x4b   : > { %v610_v50 = vrot.slane %v608_v42, 4  ;;  %v593_v60 = vsel %vm6720_vm9, %v588_v48, %v592_v29  ;;  %v6868_v61 = vcombine.low %v995_v39, %v998_v55  ;;  %v601_v62 = vor.u32 %v600_v53, %v597_v52  ;;  %v319_v15 = vld [vmem:[%s6644_s30 + $0x94] sm:$0xf]  ;;  %v436_v18 = vld [vmem:[#allocation2 + $0x5c] sm:$0x1] }
  0x4c   : > { %v4927_v0 = vrot.slane %v888_v46, 9  ;;  %v6873_v3 = vcombine.low %v583_v47, %v593_v60  ;;  %v616_v9 = vrot.slane %v614_v58, 5  ;;  %v1001_v10 = vrot.slane %v6844_v27, 5  ;;  %v889_v7 = vld [vmem:[#allocation2 + $0x54] sm:$0xe] }
  0x4d   : > { %8341 = vst [vmem:[#allocation7_spill] sm:$0xff] %v6868_v61  ;;  %v611_v5 = vor.u32 %v610_v50, %v606_v57  ;;  %5719 = vmatmul.mubr.msk.bf16.gmra.mrb[8].mxu1 %vm1135_vm6, %v6868_v61  ;;  %v602_v16 = vrot.slane %v601_v62, 4  ;;  %v1004_v17 = vrot.slane %v435_v36, 5  ;;  %v619_v19 = vshrl.u32 %v6861_v54, 16  ;;  %368 = vst.msk [vmem:[#allocation2 + $0x90] sm:$0xf] %vm330_vm3, %v318_v14 }
  0x4e   : > { %v622_v20 = vshll.u32 %v6861_v54, 16  ;;  %369 = vst.msk [vmem:[#allocation2 + $0x94] sm:$0xf] %vm330_vm3, %v319_v15  ;;  %5583 = vmatmul.mubr.msk.bf16.gmra.mrb[8].mxu0 %vm1135_vm6, %v6873_v3  ;;  %v1002_v26 = vsel %vm6655_vm5, %v4927_v0, %v1001_v10  ;;  %v1003_v28 = vrot.slane %v1001_v10, 4  ;;  %v628_v29 = vshll.u32 %v6870_v2, 16 }
  0x4f   : > { %v612_v25 = vrot.slane %v611_v5, 4  ;;  %v6889_v30 = vld [vmem:[#allocation2 + $0x60] sm:$0xf]  ;;  %v320_v31 = vld [vmem:[%s6644_s30 + $0x98] sm:$0x1]  ;;  %v607_v33 = vsel %vm6720_vm9, %v602_v16, %v606_v57  ;;  %v621_v34 = vrot.slane %v619_v19, 4 }
  0x50   : > { %v624_v35 = vrot.slane %v622_v20, 5  ;;  %v632_v36 = vshrl.u32 %v6870_v2, 16  ;;  %v6895_v37 = vld [vmem:[#allocation2 + $0x64] sm:$0xf]  ;;  %370 = vst.msk [vmem:[#allocation2 + $0x98] sm:$0x1] %vm333_vm4, %v320_v31  ;;  %v1005_v40 = vsel %vm6655_vm5, %v1003_v28, %v1004_v17 }
  0x51   : > { %v321_v6 = vld [vmem:[%s6644_s30 + $0x9c] sm:$0xf]  ;;  %v617_v39 = vsel %vm6720_vm9, %v612_v25, %v616_v9  ;;  %v630_v41 = vrot.slane %v628_v29, 5  ;;  %v638_v42 = vshll.u32 %v436_v18, 16  ;;  %v322_v46 = vld [vmem:[%s6644_s30 + $0xa0] sm:$0xf]  ;;  %v6908_v52 = vcombine.low %v1002_v26, %v1005_v40 }
  0x52   : > { %v323_v47 = vld [vmem:[%s6644_s30 + $0xa4] sm:$0x1]  ;;  %371 = vst.msk [vmem:[#allocation2 + $0x9c] sm:$0xf] %vm330_vm3, %v321_v6  ;;  %v6906_v48 = vcombine.low %v607_v33, %v617_v39  ;;  %v625_v53 = vor.u32 %v624_v35, %v621_v34  ;;  %v634_v55 = vrot.slane %v632_v36, 4  ;;  %v4928_v59 = vrot.slane %v889_v7, 9 }
  0x53   : > { %8342 = vst [vmem:[#allocation8_spill] sm:$0xff] %v6908_v52  ;;  %372 = vst.msk [vmem:[#allocation2 + $0xa0] sm:$0xf] %vm330_vm3, %v322_v46  ;;  %v324_v57 = vld [vmem:[%s6644_s30 + $0xa8] sm:$0xf]  ;;  %v640_v58 = vrot.slane %v638_v42, 5  ;;  %5722 = vmatprep.mubr.msk.bf16.mxu1 %vm1135_vm6, %v6908_v52 }
  0x54   : > { %373 = vst.msk [vmem:[#allocation2 + $0xa4] sm:$0x1] %vm333_vm4, %v323_v47  ;;  %v325_v50 = vld [vmem:[%s6644_s30 + $0xac] sm:$0xf]  ;;  %v1008_v60 = vrot.slane %v6870_v2, 5  ;;  %v1011_v62 = vrot.slane %v436_v18, 5  ;;  %v635_v5 = vor.u32 %v634_v55, %v630_v41  ;;  %5586 = vmatprep.mubr.msk.bf16.mxu0 %vm1135_vm6, %v6906_v48 }
  0x55   : > { %374 = vst.msk [vmem:[#allocation2 + $0xa8] sm:$0xf] %vm330_vm3, %v324_v57  ;;  %375 = vst.msk [vmem:[#allocation2 + $0xac] sm:$0xf] %vm330_vm3, %v325_v50  ;;  %v626_v0 = vrot.slane %v625_v53, 4  ;;  %v643_v9 = vshrl.u32 %v6889_v30, 16 }
  0x56   : > { %v646_v10 = vshll.u32 %v6889_v30, 16  ;;  %v326_v14 = vld [vmem:[%s6644_s30 + $0xb0] sm:$0x1]  ;;  %v1009_v15 = vsel %vm6655_vm5, %v4928_v59, %v1008_v60  ;;  %v1010_v16 = vrot.slane %v1008_v60, 4  ;;  %v652_v17 = vshll.u32 %v6895_v37, 16 }
  0x57   : > { %v656_v18 = vshrl.u32 %v6895_v37, 16  ;;  %v890_v19 = vld [vmem:[#allocation2 + $0x60] sm:$0xe]  ;;  %376 = vst.msk [vmem:[#allocation2 + $0xb0] sm:$0x1] %vm333_vm4, %v326_v14  ;;  %v631_v20 = vsel %vm6720_vm9, %v626_v0, %v630_v41  ;;  %v636_v7 = vrot.slane %v635_v5, 4 }
  0x58   : > { %v437_v25 = vld [vmem:[#allocation2 + $0x68] sm:$0x1]  ;;  %v645_v26 = vrot.slane %v643_v9, 4  ;;  %v648_v28 = vrot.slane %v646_v10, 5  ;;  %v1012_v29 = vsel %vm6655_vm5, %v1010_v16, %v1011_v62  ;;  %v654_v31 = vrot.slane %v652_v17, 5 }
  0x59   : > { %v658_v33 = vrot.slane %v656_v18, 4  ;;  %v662_v34 = vshll.u32 %v437_v25, 16  ;;  %v6933_v35 = vld [vmem:[#allocation2 + $0x6c] sm:$0xf]  ;;  %v641_v36 = vsel %vm6720_vm9, %v636_v7, %v640_v58  ;;  %v6937_v6 = vcombine.low %v1009_v15, %v1012_v29  ;;  %v6939_v41 = vld [vmem:[#allocation2 + $0x70] sm:$0xf] }
  0x5a   : > { %v649_v39 = vor.u32 %v648_v28, %v645_v26  ;;  %v4929_v40 = vrot.slane %v890_v19, 9  ;;  %v6941_v42 = vcombine.low %v631_v20, %v641_v36  ;;  %v1015_v53 = vrot.slane %v6895_v37, 5  ;;  %v891_v5 = vld [vmem:[#allocation2 + $0x6c] sm:$0xe]  ;;  %v438_v10 = vld [vmem:[#allocation2 + $0x74] sm:$0x1] }
  0x5b   : > { %8343 = vst [vmem:[#allocation9_spill] sm:$0xff] %v6937_v6  ;;  %v659_v46 = vor.u32 %v658_v33, %v654_v31  ;;  %v664_v47 = vrot.slane %v662_v34, 5  ;;  %5723 = vmatmul.mubr.msk.bf16.gmra.mrb[12].mxu1 %vm1135_vm6, %v6937_v6  ;;  %v1018_v57 = vrot.slane %v437_v25, 5  ;;  %v667_v50 = vshrl.u32 %v6933_v35, 16  ;;  %v6960_v7 = vld [vmem:[#allocation2 + $0x78] sm:$0xf] }
  0x5c   : > { %v650_v55 = vrot.slane %v649_v39, 4  ;;  %v670_v58 = vshll.u32 %v6933_v35, 16  ;;  %5587 = vmatmul.mubr.msk.bf16.gmra.mrb[12].mxu0 %vm1135_vm6, %v6941_v42  ;;  %v1016_v60 = vsel %vm6655_vm5, %v4929_v40, %v1015_v53  ;;  %v1017_v62 = vrot.slane %v1015_v53, 4  ;;  %v6962_v25 = vld [vmem:[#allocation2 + $0x7c] sm:$0xf] }
  0x5d   : > { %v660_v59 = vrot.slane %v659_v46, 4  ;;  %v676_v0 = vshll.u32 %v6939_v41, 16  ;;  %v669_v14 = vrot.slane %v667_v50, 4  ;;  %v680_v16 = vshrl.u32 %v6939_v41, 16  ;;  %v327_v33 = vld [vmem:[%s6644_s30 + $0xb4] sm:$0xf] }
  0x5e   : > { %v655_v9 = vsel %vm6720_vm9, %v650_v55, %v654_v31  ;;  %v672_v15 = vrot.slane %v670_v58, 5  ;;  %v1019_v18 = vsel %vm6655_vm5, %v1017_v62, %v1018_v57  ;;  %v686_v20 = vshll.u32 %v438_v10, 16  ;;  %v328_v34 = vld [vmem:[%s6644_s30 + $0xb8] sm:$0xf]  ;;  %377 = vst.msk [vmem:[#allocation2 + $0xb4] sm:$0xf] %vm330_vm3, %v327_v33 }
  0x5f   : > { %v665_v17 = vsel %vm6720_vm9, %v660_v59, %v664_v47  ;;  %v678_v19 = vrot.slane %v676_v0, 5  ;;  %v6966_v28 = vcombine.low %v1016_v60, %v1019_v18  ;;  %v682_v31 = vrot.slane %v680_v16, 4  ;;  %v329_v47 = vld [vmem:[%s6644_s30 + $0xbc] sm:$0x1]  ;;  %378 = vst.msk [vmem:[#allocation2 + $0xb8] sm:$0xf] %vm330_vm3, %v328_v34 }
  0x60   : > { %v6964_v26 = vcombine.low %v655_v9, %v665_v17  ;;  %v673_v29 = vor.u32 %v672_v15, %v669_v14  ;;  %v688_v36 = vrot.slane %v686_v20, 5  ;;  %v4930_v39 = vrot.slane %v891_v5, 9  ;;  %v892_v58 = vld [vmem:[#allocation2 + $0x78] sm:$0xe]  ;;  %379 = vst.msk [vmem:[#allocation2 + $0xbc] sm:$0x1] %vm333_vm4, %v329_v47 }
  0x61   : > { %8344 = vst [vmem:[#allocation10_spill] sm:$0xff] %v6966_v28  ;;  %v1022_v40 = vrot.slane %v6939_v41, 5  ;;  %v1025_v46 = vrot.slane %v438_v10, 5  ;;  %5726 = vmatprep.mubr.msk.bf16.mxu1 %vm1135_vm6, %v6966_v28  ;;  %v683_v55 = vor.u32 %v682_v31, %v678_v19  ;;  %v691_v57 = vshrl.u32 %v6960_v7, 16  ;;  %v6988_v5 = vld [vmem:[%s8294_s2 + $0x4] sm:$0x3] }
  0x62   : > { %v674_v53 = vrot.slane %v673_v29, 4  ;;  %5590 = vmatprep.mubr.msk.bf16.mxu0 %vm1135_vm6, %v6964_v26  ;;  %v694_v50 = vshll.u32 %v6960_v7, 16  ;;  %v700_v62 = vshll.u32 %v6962_v25, 16  ;;  %v704_v0 = vshrl.u32 %v6962_v25, 16  ;;  %v439_v14 = vld [vmem:[#allocation2 + $0x80] sm:$0x1]  ;;  %6502 = vmatprep.subr.msk.bf16.mxu0 %vm1184_vm0, %v6988_v5 }
  0x63   : > { %v1023_v59 = vsel %vm6655_vm5, %v4930_v39, %v1022_v40  ;;  %v1024_v60 = vrot.slane %v1022_v40, 4  ;;  %v684_v10 = vrot.slane %v683_v55, 4  ;;  %v693_v15 = vrot.slane %v691_v57, 4  ;;  %v6996_v31 = vld [vmem:[#allocation2 + $0x84] sm:$0xf] }
  0x64   : > { %v679_v9 = vsel %vm6720_vm9, %v674_v53, %v678_v19  ;;  %v696_v16 = vrot.slane %v694_v50, 5  ;;  %v702_v18 = vrot.slane %v700_v62, 5  ;;  %v706_v20 = vrot.slane %v704_v0, 4  ;;  %v7002_v40 = vld [vmem:[#allocation2 + $0x88] sm:$0xf] }
  0x65   : > { %v1026_v17 = vsel %vm6655_vm5, %v1024_v60, %v1025_v46  ;;  %v710_v29 = vshll.u32 %v439_v14, 16  ;;  %v689_v33 = vsel %vm6720_vm9, %v684_v10, %v688_v36  ;;  %v4931_v39 = vrot.slane %v892_v58, 9 }
  0x66   : > { %v7000_v34 = vcombine.low %v1023_v59, %v1026_v17  ;;  %v697_v19 = vor.u32 %v696_v16, %v693_v15  ;;  %v7004_v47 = vcombine.low %v679_v9, %v689_v33  ;;  %v707_v53 = vor.u32 %v706_v20, %v702_v18  ;;  %v893_v9 = vld [vmem:[#allocation2 + $0x84] sm:$0xe]  ;;  %v440_v15 = vld [vmem:[#allocation2 + $0x8c] sm:$0x1] }
  0x67   : > { %v712_v55 = vrot.slane %v710_v29, 5  ;;  %v1029_v46 = vrot.slane %v6962_v25, 5  ;;  %v1032_v50 = vrot.slane %v439_v14, 5  ;;  %v715_v60 = vshrl.u32 %v6996_v31, 16 }
  0x68   : > { %8345 = vst [vmem:[#allocation11_spill] sm:$0xff] %v7000_v34  ;;  %8346 = vst [vmem:[#allocation12_spill] sm:$0xff] %v7004_v47  ;;  %5727 = vmatmul.mubr.msk.bf16.gmra.mrb[16].mxu1 %vm1135_vm6, %v7000_v34  ;;  %v698_v57 = vrot.slane %v697_v19, 4  ;;  %v718_v36 = vshll.u32 %v6996_v31, 16  ;;  %5591 = vmatmul.mubr.msk.bf16.gmra.mrb[16].mxu0 %vm1135_vm6, %v7004_v47  ;;  %v708_v58 = vrot.slane %v707_v53, 4  ;;  %v724_v0 = vshll.u32 %v7002_v40, 16 }
  0x69   : > { %v1030_v59 = vsel %vm6655_vm5, %v4931_v39, %v1029_v46  ;;  %v1031_v62 = vrot.slane %v1029_v46, 4  ;;  %v717_v14 = vrot.slane %v715_v60, 4  ;;  %v728_v17 = vshrl.u32 %v7002_v40, 16  ;;  %v7023_v39 = vld [vmem:[#allocation2 + $0x90] sm:$0xf] }
  0x6a   : > { %v703_v10 = vsel %vm6720_vm9, %v698_v57, %v702_v18  ;;  %v720_v16 = vrot.slane %v718_v36, 5  ;;  %v713_v20 = vsel %vm6720_vm9, %v708_v58, %v712_v55  ;;  %v726_v33 = vrot.slane %v724_v0, 5  ;;  %v7029_v60 = vld [vmem:[#allocation2 + $0x94] sm:$0xf] }
  0x6b   : > { %v1033_v29 = vsel %vm6655_vm5, %v1031_v62, %v1032_v50  ;;  %v734_v19 = vshll.u32 %v440_v15, 16  ;;  %v7025_v53 = vcombine.low %v703_v10, %v713_v20  ;;  %v730_v57 = vrot.slane %v728_v17, 4  ;;  %v441_v20 = vld [vmem:[#allocation2 + $0x98] sm:$0x1] }
  0x6c   : > { %v7027_v46 = vcombine.low %v1030_v59, %v1033_v29  ;;  %v721_v18 = vor.u32 %v720_v16, %v717_v14  ;;  %v4932_v34 = vrot.slane %v893_v9, 9  ;;  %v1036_v28 = vrot.slane %v7002_v40, 5  ;;  %v894_v14 = vld [vmem:[#allocation2 + $0x90] sm:$0xe] }
  0x6d   : > { %8347 = vst [vmem:[#allocation13_spill] sm:$0xff] %v7025_v53  ;;  %v736_v36 = vrot.slane %v734_v19, 5  ;;  %v1039_v55 = vrot.slane %v440_v15, 5  ;;  %v731_v58 = vor.u32 %v730_v57, %v726_v33  ;;  %5594 = vmatprep.mubr.msk.bf16.mxu0 %vm1135_vm6, %v7025_v53  ;;  %v739_v59 = vshrl.u32 %v7023_v39, 16 }
  0x6e   : > { %8348 = vst [vmem:[#allocation14_spill] sm:$0xff] %v7027_v46  ;;  %5730 = vmatprep.mubr.msk.bf16.mxu1 %vm1135_vm6, %v7027_v46  ;;  %v722_v50 = vrot.slane %v721_v18, 4  ;;  %v742_v62 = vshll.u32 %v7023_v39, 16  ;;  %v1037_v0 = vsel %vm6655_vm5, %v4932_v34, %v1036_v28  ;;  %v1038_v10 = vrot.slane %v1036_v28, 4  ;;  %v7046_v34 = vld [vmem:[#allocation2 + $0x9c] sm:$0xf] }
  0x6f   : > { %v748_v9 = vshll.u32 %v7029_v60, 16  ;;  %v752_v15 = vshrl.u32 %v7029_v60, 16  ;;  %v732_v17 = vrot.slane %v731_v58, 4  ;;  %v741_v29 = vrot.slane %v739_v59, 4 }
  0x70   : > { %v727_v16 = vsel %vm6720_vm9, %v722_v50, %v726_v33  ;;  %v744_v19 = vrot.slane %v742_v62, 5  ;;  %v1040_v18 = vsel %vm6655_vm5, %v1038_v10, %v1039_v55  ;;  %v758_v6 = vshll.u32 %v441_v20, 16  ;;  %v7052_v33 = vld [vmem:[#allocation2 + $0xa0] sm:$0xf] }
  0x71   : > { %v750_v57 = vrot.slane %v748_v9, 5  ;;  %v754_v46 = vrot.slane %v752_v15, 4  ;;  %v737_v28 = vsel %vm6720_vm9, %v732_v17, %v736_v36  ;;  %v7050_v52 = vcombine.low %v1037_v0, %v1040_v18 }
  0x72   : > { %v745_v61 = vor.u32 %v744_v19, %v741_v29  ;;  %v4933_v24 = vrot.slane %v894_v14, 9  ;;  %v7054_v50 = vcombine.low %v727_v16, %v737_v28  ;;  %v760_v59 = vrot.slane %v758_v6, 5  ;;  %v442_v6 = vld [vmem:[#allocation2 + $0xa4] sm:$0x1]  ;;  %v895_v29 = vld [vmem:[#allocation2 + $0x9c] sm:$0xe] }
  0x73   : > { %8349 = vst [vmem:[#allocation15_spill] sm:$0xff] %v7050_v52  ;;  %v755_v58 = vor.u32 %v754_v46, %v750_v57  ;;  %v1043_v55 = vrot.slane %v7029_v60, 5  ;;  %5731 = vmatmul.mubr.msk.bf16.gmra.mrb[20].mxu1 %vm1135_vm6, %v7050_v52  ;;  %v1046_v10 = vrot.slane %v441_v20, 5  ;;  %v763_v36 = vshrl.u32 %v7046_v34, 16 }
  0x74   : > { %8350 = vst [vmem:[#allocation16_spill] sm:$0xff] %v7054_v50  ;;  %v746_v62 = vrot.slane %v745_v61, 4  ;;  %v766_v0 = vshll.u32 %v7046_v34, 16  ;;  %5595 = vmatmul.mubr.msk.bf16.gmra.mrb[20].mxu0 %vm1135_vm6, %v7054_v50  ;;  %v772_v14 = vshll.u32 %v7052_v33, 16  ;;  %v776_v20 = vshrl.u32 %v7052_v33, 16 }
  0x75   : > { %v756_v9 = vrot.slane %v755_v58, 4  ;;  %v1044_v15 = vsel %vm6655_vm5, %v4933_v24, %v1043_v55  ;;  %v1045_v46 = vrot.slane %v1043_v55, 4  ;;  %v765_v16 = vrot.slane %v763_v36, 4  ;;  %v7074_v58 = vld [vmem:[#allocation2 + $0xa8] sm:$0xf] }
  0x76   : > { %v751_v61 = vsel %vm6720_vm9, %v746_v62, %v750_v57  ;;  %v768_v17 = vrot.slane %v766_v0, 5  ;;  %v774_v24 = vrot.slane %v772_v14, 5  ;;  %v782_v28 = vshll.u32 %v442_v6, 16  ;;  %v7076_v55 = vld [vmem:[#allocation2 + $0xac] sm:$0xf] }
  0x77   : > { %v761_v19 = vsel %vm6720_vm9, %v756_v9, %v760_v59  ;;  %v1047_v18 = vsel %vm6655_vm5, %v1045_v46, %v1046_v10  ;;  %v778_v36 = vrot.slane %v776_v20, 4  ;;  %v380_v10 = vld [vmem:[%s7081_s12] sm:$0xf]  ;;  %v381_v0 = vld [vmem:[%s7081_s12 + $0x4] sm:$0xf]  ;;  %v4934_v46 = vrot.slane %v895_v29, 9 }
  0x78   : > { %v7083_v57 = vcombine.low %v751_v61, %v761_v19  ;;  %v7085_v62 = vcombine.low %v1044_v15, %v1047_v18  ;;  %v769_v59 = vor.u32 %v768_v17, %v765_v16  ;;  %v784_v9 = vrot.slane %v782_v28, 5  ;;  %387 = vst.msk [vmem:[#allocation2 + $0xc0] sm:$0xf] %vm330_vm3, %v380_v10  ;;  %388 = vst.msk [vmem:[#allocation2 + $0xc4] sm:$0xf] %vm330_vm3, %v381_v0 }
  0x79   : > { %v1050_v14 = vrot.slane %v7052_v33, 5  ;;  %v1053_v52 = vrot.slane %v442_v6, 5  ;;  %v779_v15 = vor.u32 %v778_v36, %v774_v24  ;;  %v443_v16 = vld [vmem:[#allocation2 + $0xb0] sm:$0x1]  ;;  %v787_v17 = vshrl.u32 %v7074_v58, 16 }
  0x7a   : > { %8351 = vst [vmem:[#allocation17_spill] sm:$0xff] %v7083_v57  ;;  %8352 = vst [vmem:[#allocation18_spill] sm:$0xff] %v7085_v62  ;;  %5734 = vmatprep.mubr.msk.bf16.mxu1 %vm1135_vm6, %v7085_v62  ;;  %v770_v61 = vrot.slane %v769_v59, 4  ;;  %5598 = vmatprep.mubr.msk.bf16.mxu0 %vm1135_vm6, %v7083_v57  ;;  %v790_v20 = vshll.u32 %v7074_v58, 16  ;;  %v796_v19 = vshll.u32 %v7076_v55, 16  ;;  %v800_v18 = vshrl.u32 %v7076_v55, 16 }
  0x7b   : > { %v1051_v6 = vsel %vm6655_vm5, %v4934_v46, %v1050_v14  ;;  %v1052_v29 = vrot.slane %v1050_v14, 4  ;;  %v896_v28 = vld [vmem:[#allocation2 + $0xa8] sm:$0xe]  ;;  %v780_v36 = vrot.slane %v779_v15, 4  ;;  %v789_v10 = vrot.slane %v787_v17, 4 }
  0x7c   : > { %v775_v59 = vsel %vm6720_vm9, %v770_v61, %v774_v24  ;;  %v792_v0 = vrot.slane %v790_v20, 5  ;;  %v382_v62 = vld [vmem:[%s7081_s12 + $0x8] sm:$0x1]  ;;  %v798_v1 = vrot.slane %v796_v19, 5  ;;  %v802_v12 = vrot.slane %v800_v18, 4 }
  0x7d   : > { %v1054_v51 = vsel %vm6655_vm5, %v1052_v29, %v1053_v52  ;;  %v806_v57 = vshll.u32 %v443_v16, 16  ;;  %v7107_v46 = vld [vmem:[#allocation2 + $0xb4] sm:$0xf]  ;;  %389 = vst.msk [vmem:[#allocation2 + $0xc8] sm:$0x1] %vm333_vm4, %v382_v62  ;;  %v785_v14 = vsel %vm6720_vm9, %v780_v36, %v784_v9  ;;  %v4935_v61 = vrot.slane %v896_v28, 9 }
  0x7e   : > { %v7112_v50 = vcombine.low %v1051_v6, %v1054_v51  ;;  %v793_v24 = vor.u32 %v792_v0, %v789_v10  ;;  %v424_v15 = vld [vmem:[#allocation2 + $0xb8] sm:$0xf]  ;;  %v7114_v17 = vcombine.low %v775_v59, %v785_v14  ;;  %v803_v20 = vor.u32 %v802_v12, %v798_v1  ;;  %v897_v10 = vld [vmem:[#allocation2 + $0xb4] sm:$0xe] }
  0x7f   : > { %v808_v53 = vrot.slane %v806_v57, 5  ;;  %v1057_v52 = vrot.slane %v7076_v55, 5  ;;  %v1060_v19 = vrot.slane %v443_v16, 5  ;;  %v811_v62 = vshrl.u32 %v7107_v46, 16  ;;  %v444_v57 = vld [vmem:[#allocation2 + $0xbc] sm:$0x1] }
  0x80   : > { %8353 = vst [vmem:[#allocation19_spill] sm:$0xff] %v7112_v50  ;;  %8354 = vst [vmem:[#allocation20_spill] sm:$0xff] %v7114_v17  ;;  %5735 = vmatmul.mubr.msk.bf16.gmra.mrb[24].mxu1 %vm1135_vm6, %v7112_v50  ;;  %v794_v29 = vrot.slane %v793_v24, 4  ;;  %v814_v9 = vshll.u32 %v7107_v46, 16  ;;  %5599 = vmatmul.mubr.msk.bf16.gmra.mrb[24].mxu0 %vm1135_vm6, %v7114_v17  ;;  %v804_v51 = vrot.slane %v803_v20, 4  ;;  %v820_v18 = vshll.u32 %v424_v15, 16 }
  0x81   : > { %v1058_v6 = vsel %vm6655_vm5, %v4935_v61, %v1057_v52  ;;  %v1059_v12 = vrot.slane %v1057_v52, 4  ;;  %v813_v59 = vrot.slane %v811_v62, 4  ;;  %v824_v16 = vshrl.u32 %v424_v15, 16 }
  0x82   : > { %v799_v28 = vsel %vm6720_vm9, %v794_v29, %v798_v1  ;;  %v816_v36 = vrot.slane %v814_v9, 5  ;;  %v809_v0 = vsel %vm6720_vm9, %v804_v51, %v808_v53  ;;  %v822_v24 = vrot.slane %v820_v18, 5  ;;  %v6546_v18 = vld [vmem:[#allocation2 + $0x4] sm:$0xf] }
  0x83   : > { %v1061_v14 = vsel %vm6655_vm5, %v1059_v12, %v1060_v19  ;;  %v830_v20 = vshll.u32 %v444_v57, 16  ;;  %v7131_v50 = vcombine.low %v799_v28, %v809_v0  ;;  %v826_v17 = vrot.slane %v824_v16, 4  ;;  %v6547_v28 = vld [vmem:[#allocation2] sm:$0xf] }
  0x84   : > { %v7133_v61 = vcombine.low %v1058_v6, %v1061_v14  ;;  %v817_v52 = vor.u32 %v816_v36, %v813_v59  ;;  %v4936_v47 = vrot.slane %v897_v10, 9  ;;  %v1064_v1 = vrot.slane %v424_v15, 5 }
  0x85   : > { %v1067_v29 = vrot.slane %v444_v57, 5  ;;  %v827_v9 = vor.u32 %v826_v17, %v822_v24  ;;  %v832_v53 = vrot.slane %v830_v20, 5  ;;  %5602 = vmatprep.mubr.msk.bf16.mxu0 %vm1135_vm6, %v7131_v50  ;;  %v4972_v57 = vcombine.low %v6547_v28, %v6546_v18 }
  0x86   : > { %5738 = vmatprep.mubr.msk.bf16.mxu1 %vm1135_vm6, %v7133_v61  ;;  %v818_v62 = vrot.slane %v817_v52, 4  ;;  %v1065_v19 = vsel %vm6655_vm5, %v4936_v47, %v1064_v1  ;;  %v1066_v51 = vrot.slane %v1064_v1, 4  ;;  %v7147_v17 = vcombine.low %v6838_v22, %v6844_v27 }
  0x87   : > { %v828_v12 = vrot.slane %v827_v9, 4  ;;  %v7151_v36 = vcombine.low %v6861_v54, %v6870_v2  ;;  %v7155_v47 = vcombine.low %v6889_v30, %v6895_v37  ;;  %v7163_v0 = vcombine.low %v6933_v35, %v6939_v41  ;;  %v6548_v41 = vld [vmem:[#allocation2 + $0x10] sm:$0xf]  ;;  %v5197_v9 = vld [vmem:[%s8294_s2 + $0x1a] sm:$0x3] }
  0x88   : > { %v823_v6 = vsel %vm6720_vm9, %v818_v62, %v822_v24  ;;  %v1068_v59 = vsel %vm6655_vm5, %v1066_v51, %v1067_v29  ;;  %v7167_v22 = vcombine.low %v6960_v7, %v6962_v25  ;;  %v7173_v54 = vcombine.low %v6996_v31, %v7002_v40  ;;  %v6549_v7 = vld [vmem:[#allocation2 + $0xc] sm:$0xf]  ;;  %v6550_v40 = vld [vmem:[#allocation2 + $0x18] sm:$0xf]  ;;  %v425_v51 = vld [vmem:[#allocation2 + $0xc0] sm:$0xf] }
  0x89   : > { %v833_v16 = vsel %vm6720_vm9, %v828_v12, %v832_v53  ;;  %v7159_v10 = vcombine.low %v1065_v19, %v1068_v59  ;;  %v7177_v2 = vcombine.low %v7023_v39, %v7029_v60  ;;  %v7181_v30 = vcombine.low %v7046_v34, %v7052_v33  ;;  %v6551_v39 = vld [vmem:[#allocation2 + $0x1c] sm:$0xf]  ;;  %v5127_v19 = vld [vmem:[%s8294_s2 + $0x12] sm:$0x3] }
  0x8a   : > { %v7169_v27 = vcombine.low %v823_v6, %v833_v16  ;;  %v7187_v37 = vcombine.low %v7074_v58, %v7076_v55  ;;  %v7190_v35 = vcombine.low %v7107_v46, %v424_v15  ;;  %v7197_v25 = vcombine.low %v6549_v7, %v6548_v41  ;;  %v7275_v58 = vld [vmem:[#allocation2 + $0xc4] sm:$0xf]  ;;  %v445_v55 = vld [vmem:[#allocation2 + $0xc8] sm:$0x1]  ;;  %v898_v46 = vld [vmem:[#allocation2 + $0xc0] sm:$0xe] }
  0x8b   : > { %5739 = vmatmul.mubr.msk.bf16.gmra.mrb[28].mxu1 %vm1135_vm6, %v7159_v10  ;;  %v2465_v31 = vsel %vm1184_vm0, %v6727_v21, 0  ;;  %v7201_v60 = vcombine.low %v6550_v40, %v6551_v39  ;;  %v1635_v34 = vsel %vm1184_vm0, %v6988_v5, 0  ;;  %v5022_v21 = vld [vmem:[%s8294_s2 + $0x6] sm:$0x3]  ;;  %v7223_v5 = vcombine.low %v6740_v43, %v6742_v44 }
  0x8c   : > { %5603 = vmatmul.mubr.msk.bf16.gmra.mrb[28].mxu0 %vm1135_vm6, %v7169_v27  ;;  %5744 = vmatprep.mubr.msk.bf16.mxu1 %vm1135_vm6, %v6744_v45  ;;  %v5107_v45 = vld [vmem:[%s8294_s2 + $0xe] sm:$0x3]  ;;  %v7227_v33 = vcombine.low %v6765_v63, %v6771_v4  ;;  %v7239_v43 = vcombine.low %v6794_v32, %v6798_v38  ;;  %v8355_v44 = vld [vmem:[#allocation12_spill] sm:$0xff]  ;;  %v1071_v15 = vrot.slane %v7275_v58, 5  ;;  %v1074_v14 = vrot.slane %v445_v55, 5 }
  0x8d   : > { %5608 = vmatprep.mubr.msk.bf16.mxu0 %vm1135_vm6, %v4972_v57  ;;  %v8356_v63 = vld [vmem:[#allocation13_spill] sm:$0xff]  ;;  %v8357_v4 = vld [vmem:[#allocation16_spill] sm:$0xff]  ;;  %v4937_v24 = vrot.slane %v898_v46, 9  ;;  %v2669_v62 = vsel %vm1184_vm0, %v5107_v45, 0  ;;  %v1839_v53 = vsel %vm1184_vm0, %v5022_v21, 0  ;;  %v835_v6 = vshrl.u32 %v425_v51, 16 }
  0x8e   : > { %v8358_v32 = vld [vmem:[#allocation17_spill] sm:$0xff]  ;;  %v8359_v38 = vld [vmem:[#allocation20_spill] sm:$0xff]  ;;  %v1073_v20 = vrot.slane %v1071_v15, 4  ;;  %v838_v12 = vshll.u32 %v425_v51, 16  ;;  %v844_v18 = vshll.u32 %v7275_v58, 16  ;;  %v848_v28 = vshrl.u32 %v7275_v58, 16 }
  0x8f   : > { %v1072_v52 = vsel %vm6655_vm5, %v4937_v24, %v1071_v15  ;;  %v837_v57 = vrot.slane %v835_v6, 4  ;;  %v854_v40 = vshll.u32 %v445_v55, 16  ;;  %v7373_v15 = vcombine.low %v425_v51, %v7275_v58  ;;  %v5196_v58 = vld [vmem:[%s8294_s2 + $0x18] sm:$0x3]  ;;  %v8366_v51 = vld [vmem:[#allocation9_spill] sm:$0xff]  ;;  %v8367_v6 = vld [vmem:[#allocation10_spill] sm:$0xff] }
  0x90   : > { %v1075_v1 = vsel %vm6655_vm5, %v1073_v20, %v1074_v14  ;;  %v840_v59 = vrot.slane %v838_v12, 5  ;;  %v846_v16 = vrot.slane %v844_v18, 5  ;;  %v850_v41 = vrot.slane %v848_v28, 4  ;;  %v8360_v14 = vld [vmem:[#allocation3_spill] sm:$0xff]  ;;  %v8361_v20 = vld [vmem:[#allocation4_spill] sm:$0xff]  ;;  %v8369_v18 = vld [vmem:[#allocation14_spill] sm:$0xff] }
  0x91   : > { %v7288_v29 = vcombine.low %v1072_v52, %v1075_v1  ;;  %v3841_v24 = vsel %vm1184_vm0, %v5197_v9, 0  ;;  %v3100_v52 = vsel %vm1184_vm0, %v5127_v19, 0  ;;  %v5126_v1 = vld [vmem:[%s8294_s2 + $0x10] sm:$0x3]  ;;  %v8368_v12 = vld [vmem:[#allocation11_spill] sm:$0xff] }
  0x92   : > { %v841_v7 = vor.u32 %v840_v59, %v837_v57  ;;  %v8370_v28 = vld [vmem:[#allocation15_spill] sm:$0xff]  ;;  %v8371_v57 = vld [vmem:[#allocation18_spill] sm:$0xff] }
  0x93   : > { %5745 = vmatmul.mubr.msk.bf16.vlgmr.msra.gmra.mrb[0].mxu1 %vm1135_vm6, %v6749_v49  ;;  %v8372_v59 = vld [vmem:[#allocation19_spill] sm:$0xff] }
  0x94   : > { %5777 = vmatpush3.bf16.msra.mxu1 %v2465_v31  ;;  %5609 = vmatmul.mubr.msk.bf16.vlgmr.msra.gmra.mrb[0].mxu0 %vm1135_vm6, %v7197_v25  ;;  %v851_v31 = vor.u32 %v850_v41, %v846_v16  ;;  %v842_v39 = vrot.slane %v841_v7, 4  ;;  %v5230_v41 = vld [vmem:[%s8294_s2 + $0x1c] sm:$0x3]  ;;  %v3264_v7 = vsel %vm1184_vm0, %v5126_v1, 0 }
  0x95   : > { %5748 = vmatprep.mubr.msk.bf16.mxu1 %vm1135_vm6, %v6775_v8  ;;  %5612 = vmatprep.mubr.msk.bf16.mxu0 %vm1135_vm6, %v7201_v60 }
  0x96   : > { %6507 = vmatprep.subr.msk.bf16.mxu1 %vm1184_vm0, %v5107_v45  ;;  %5641 = vmatpush3.bf16.msra.mxu0 %v1635_v34  ;;  %v852_v45 = vrot.slane %v851_v31, 4  ;;  %v856_v34 = vrot.slane %v854_v40, 5  ;;  %v5160_v31 = vld [vmem:[%s8294_s2 + $0x14] sm:$0x3]  ;;  %v383_v40 = vld [vmem:[%s7081_s12 + $0xc] sm:$0xf] }
  0x97   : > { %6503 = vmatprep.subr.msk.bf16.mxu0 %vm1184_vm0, %v5022_v21  ;;  %v847_v21 = vsel %vm6720_vm9, %v842_v39, %v846_v16  ;;  %v4005_v16 = vsel %vm1184_vm0, %v5196_v58, 0  ;;  %v384_v39 = vld [vmem:[%s7081_s12 + $0x10] sm:$0xf]  ;;  %390 = vst.msk [vmem:[#allocation2 + $0xcc] sm:$0xf] %vm330_vm3, %v383_v40 }
  0x98   : > { %v857_v55 = vsel %vm6720_vm9, %v852_v45, %v856_v34  ;;  %391 = vst.msk [vmem:[#allocation2 + $0xd0] sm:$0xf] %vm330_vm3, %v384_v39  ;;  %v385_v45 = vld [vmem:[%s7081_s12 + $0x14] sm:$0x1]  ;;  %v4171_v34 = vsel %vm1184_vm0, %v5230_v41, 0  ;;  %s5299_s12 = sshll.u32 %s8380_s15, 9 }
  0x99   : > { %v7370_v46 = vcombine.low %v847_v21, %v857_v55  ;;  %392 = vst.msk [vmem:[#allocation2 + $0xd4] sm:$0x1] %vm333_vm4, %v385_v45  ;;  %v5247_v21 = vld [vmem:[%s8294_s2 + $0x1e] sm:$0x3]  ;;  %v3437_v55 = vsel %vm1184_vm0, %v5160_v31, 0  ;;  %s7865_s21 = scalar_lea.vmem %s8296_s4, %s5299_s12 }
  0x9b   : > { %5749 = vmatmul.mubr.msk.bf16.gmra.mrb[4].mxu1 %vm1135_vm6, %v6817_v56 }
  0x9c   : > { %5613 = vmatmul.mubr.msk.bf16.gmra.mrb[4].mxu0 %vm1135_vm6, %v7223_v5  ;;  %5752 = vmatprep.mubr.msk.bf16.mxu1 %vm1135_vm6, %v6840_v23 }
  0x9d   : > { %5616 = vmatprep.mubr.msk.bf16.mxu0 %vm1135_vm6, %v7227_v33 }
  0x9f   : > { %v7667_v40 = vld [vmem:[#allocation2 + $0xd0] sm:$0xf] }
  0xa3   : > { %5753 = vmatmul.mubr.msk.bf16.gmra.mrb[8].mxu1 %vm1135_vm6, %v6873_v3 }
  0xa4   : > { %5617 = vmatmul.mubr.msk.bf16.gmra.mrb[8].mxu0 %vm1135_vm6, %v7239_v43  ;;  %5756 = vmatprep.mubr.msk.bf16.mxu1 %vm1135_vm6, %v6906_v48 }
  0xa5   : > { %5620 = vmatprep.mubr.msk.bf16.mxu0 %vm1135_vm6, %v7147_v17 }
  0xab   : > { %5757 = vmatmul.mubr.msk.bf16.gmra.mrb[12].mxu1 %vm1135_vm6, %v6941_v42 }
  0xac   : > { %5621 = vmatmul.mubr.msk.bf16.gmra.mrb[12].mxu0 %vm1135_vm6, %v7151_v36  ;;  %5760 = vmatprep.mubr.msk.bf16.mxu1 %vm1135_vm6, %v6964_v26 }
  0xad   : > { %5624 = vmatprep.mubr.msk.bf16.mxu0 %vm1135_vm6, %v7155_v47 }
  0xb3   : > { %5761 = vmatmul.mubr.msk.bf16.gmra.mrb[16].mxu1 %vm1135_vm6, %v8355_v44 }
  0xb4   : > { %5625 = vmatmul.mubr.msk.bf16.gmra.mrb[16].mxu0 %vm1135_vm6, %v7163_v0  ;;  %5764 = vmatprep.mubr.msk.bf16.mxu1 %vm1135_vm6, %v8356_v63 }
  0xb5   : > { %5628 = vmatprep.mubr.msk.bf16.mxu0 %vm1135_vm6, %v7167_v22 }
  0xbb   : > { %5765 = vmatmul.mubr.msk.bf16.gmra.mrb[20].mxu1 %vm1135_vm6, %v8357_v4 }
  0xbc   : > { %5629 = vmatmul.mubr.msk.bf16.gmra.mrb[20].mxu0 %vm1135_vm6, %v7173_v54  ;;  %5768 = vmatprep.mubr.msk.bf16.mxu1 %vm1135_vm6, %v8358_v32 }
  0xbd   : > { %5632 = vmatprep.mubr.msk.bf16.mxu0 %vm1135_vm6, %v7177_v2 }
  0xc3   : > { %5769 = vmatmul.mubr.msk.bf16.gmra.mrb[24].mxu1 %vm1135_vm6, %v8359_v38 }
  0xc4   : > { %5633 = vmatmul.mubr.msk.bf16.gmra.mrb[24].mxu0 %vm1135_vm6, %v7181_v30  ;;  %5772 = vmatprep.mubr.msk.bf16.mxu1 %vm1135_vm6, %v7131_v50 }
  0xc5   : > { %5636 = vmatprep.mubr.msk.bf16.mxu0 %vm1135_vm6, %v7187_v37 }
  0xcb   : > { %5773 = vmatmul.mubr.msk.bf16.gmra.mrb[28].mxu1 %vm1135_vm6, %v7169_v27 }
  0xcc   : > { %5637 = vmatmul.mubr.msk.bf16.gmra.mrb[28].mxu0 %vm1135_vm6, %v7190_v35  ;;  %5778 = vmatprep.mubr.msk.bf16.mxu1 %vm1135_vm6, %v6749_v49 }
  0xcd   : > { %5642 = vmatprep.mubr.msk.bf16.mxu0 %vm1135_vm6, %v7197_v25 }
  0xd3   : > { %5779 = vmatmul.mubr.msk.bf16.vlgmr.msra.gmra.mrb[0].mxu1 %vm1135_vm6, %v6775_v8 }
  0xd4   : > { %5811 = vmatpush3.bf16.msra.mxu1 %v2669_v62  ;;  %5643 = vmatmul.mubr.msk.bf16.vlgmr.msra.gmra.mrb[0].mxu0 %vm1135_vm6, %v7201_v60  ;;  %v8362_v62 = vld [vmem:[#allocation5_spill] sm:$0xff] }
  0xd5   : > { %5782 = vmatprep.mubr.msk.bf16.mxu1 %vm1135_vm6, %v6817_v56  ;;  %5646 = vmatprep.mubr.msk.bf16.mxu0 %vm1135_vm6, %v7223_v5 }
  0xd6   : > { %6512 = vmatprep.subr.msk.bf16.mxu1 %vm1184_vm0, %v5197_v9  ;;  %5675 = vmatpush3.bf16.msra.mxu0 %v1839_v53  ;;  %v8363_v9 = vld [vmem:[#allocation6_spill] sm:$0xff]  ;;  %v8364_v53 = vld [vmem:[#allocation7_spill] sm:$0xff] }
  0xd7   : > { %6508 = vmatprep.subr.msk.bf16.mxu0 %vm1184_vm0, %v5127_v19  ;;  %v8365_v19 = vld [vmem:[#allocation8_spill] sm:$0xff] }
  0xdb   : > { %5783 = vmatmul.mubr.msk.bf16.gmra.mrb[4].mxu1 %vm1135_vm6, %v6840_v23 }
  0xdc   : > { %5647 = vmatmul.mubr.msk.bf16.gmra.mrb[4].mxu0 %vm1135_vm6, %v7227_v33  ;;  %5786 = vmatprep.mubr.msk.bf16.mxu1 %vm1135_vm6, %v6873_v3 }
  0xdd   : > { %5650 = vmatprep.mubr.msk.bf16.mxu0 %vm1135_vm6, %v7239_v43 }
  0xe3   : > { %5787 = vmatmul.mubr.msk.bf16.gmra.mrb[8].mxu1 %vm1135_vm6, %v6906_v48 }
  0xe4   : > { %5651 = vmatmul.mubr.msk.bf16.gmra.mrb[8].mxu0 %vm1135_vm6, %v7147_v17  ;;  %5790 = vmatprep.mubr.msk.bf16.mxu1 %vm1135_vm6, %v6941_v42 }
  0xe5   : > { %5654 = vmatprep.mubr.msk.bf16.mxu0 %vm1135_vm6, %v7151_v36 }
  0xeb   : > { %5791 = vmatmul.mubr.msk.bf16.gmra.mrb[12].mxu1 %vm1135_vm6, %v6964_v26 }
  0xec   : > { %5655 = vmatmul.mubr.msk.bf16.gmra.mrb[12].mxu0 %vm1135_vm6, %v7155_v47  ;;  %5794 = vmatprep.mubr.msk.bf16.mxu1 %vm1135_vm6, %v8355_v44 }
  0xed   : > { %5658 = vmatprep.mubr.msk.bf16.mxu0 %vm1135_vm6, %v7163_v0 }
  0xf3   : > { %5795 = vmatmul.mubr.msk.bf16.gmra.mrb[16].mxu1 %vm1135_vm6, %v8356_v63 }
  0xf4   : > { %5659 = vmatmul.mubr.msk.bf16.gmra.mrb[16].mxu0 %vm1135_vm6, %v7167_v22  ;;  %5798 = vmatprep.mubr.msk.bf16.mxu1 %vm1135_vm6, %v8357_v4 }
  0xf5   : > { %5662 = vmatprep.mubr.msk.bf16.mxu0 %vm1135_vm6, %v7173_v54 }
  0xfb   : > { %5799 = vmatmul.mubr.msk.bf16.gmra.mrb[20].mxu1 %vm1135_vm6, %v8358_v32 }
  0xfc   : > { %5663 = vmatmul.mubr.msk.bf16.gmra.mrb[20].mxu0 %vm1135_vm6, %v7177_v2  ;;  %5802 = vmatprep.mubr.msk.bf16.mxu1 %vm1135_vm6, %v8359_v38 }
  0xfd   : > { %5666 = vmatprep.mubr.msk.bf16.mxu0 %vm1135_vm6, %v7181_v30 }
 0x103   : > { %5803 = vmatmul.mubr.msk.bf16.gmra.mrb[24].mxu1 %vm1135_vm6, %v7131_v50 }
 0x104   : > { %5667 = vmatmul.mubr.msk.bf16.gmra.mrb[24].mxu0 %vm1135_vm6, %v7187_v37  ;;  %5806 = vmatprep.mubr.msk.bf16.mxu1 %vm1135_vm6, %v7169_v27 }
 0x105   : > { %5670 = vmatprep.mubr.msk.bf16.mxu0 %vm1135_vm6, %v7190_v35 }
 0x10b   : > { %5807 = vmatmul.mubr.msk.bf16.gmra.mrb[28].mxu1 %vm1135_vm6, %v7370_v46 }
 0x10c   : > { %5671 = vmatmul.mubr.msk.bf16.gmra.mrb[28].mxu0 %vm1135_vm6, %v7373_v15  ;;  %5812 = vmatprep.mubr.msk.bf16.mxu1 %vm1135_vm6, %v8360_v14 }
 0x10d   : > { %5676 = vmatprep.mubr.msk.bf16.mxu0 %vm1135_vm6, %v6749_v49 }
 0x113   : > { %5813 = vmatmul.mubr.msk.bf16.vlgmr.msra.gmra.mrb[0].mxu1 %vm1135_vm6, %v8361_v20 }
 0x114   : > { %5981 = vmatpush3.bf16.msra.mxu1 %v3841_v24  ;;  %5677 = vmatmul.mubr.msk.bf16.vlgmr.msra.gmra.mrb[0].mxu0 %vm1135_vm6, %v6775_v8 }
 0x115   : > { %5816 = vmatprep.mubr.msk.bf16.mxu1 %vm1135_vm6, %v8362_v62  ;;  %5680 = vmatprep.mubr.msk.bf16.mxu0 %vm1135_vm6, %v6817_v56 }
 0x116   : > { %6513 = vmatprep.subr.msk.bf16.mxu1 %vm1184_vm0, %v5196_v58  ;;  %5845 = vmatpush3.bf16.msra.mxu0 %v3100_v52 }
 0x117   : > { %6509 = vmatprep.subr.msk.bf16.mxu0 %vm1184_vm0, %v5126_v1 }
 0x11b   : > { %5817 = vmatmul.mubr.msk.bf16.gmra.mrb[4].mxu1 %vm1135_vm6, %v8363_v9 }
 0x11c   : > { %5681 = vmatmul.mubr.msk.bf16.gmra.mrb[4].mxu0 %vm1135_vm6, %v6840_v23  ;;  %5820 = vmatprep.mubr.msk.bf16.mxu1 %vm1135_vm6, %v8364_v53 }
 0x11d   : > { %5684 = vmatprep.mubr.msk.bf16.mxu0 %vm1135_vm6, %v6873_v3 }
 0x123   : > { %5821 = vmatmul.mubr.msk.bf16.gmra.mrb[8].mxu1 %vm1135_vm6, %v8365_v19 }
 0x124   : > { %5685 = vmatmul.mubr.msk.bf16.gmra.mrb[8].mxu0 %vm1135_vm6, %v6906_v48  ;;  %5824 = vmatprep.mubr.msk.bf16.mxu1 %vm1135_vm6, %v8366_v51 }
 0x125   : > { %5688 = vmatprep.mubr.msk.bf16.mxu0 %vm1135_vm6, %v6941_v42 }
 0x12b   : > { %5825 = vmatmul.mubr.msk.bf16.gmra.mrb[12].mxu1 %vm1135_vm6, %v8367_v6 }
 0x12c   : > { %5689 = vmatmul.mubr.msk.bf16.gmra.mrb[12].mxu0 %vm1135_vm6, %v6964_v26  ;;  %5828 = vmatprep.mubr.msk.bf16.mxu1 %vm1135_vm6, %v8368_v12 }
 0x12d   : > { %5692 = vmatprep.mubr.msk.bf16.mxu0 %vm1135_vm6, %v8355_v44 }
 0x133   : > { %5829 = vmatmul.mubr.msk.bf16.gmra.mrb[16].mxu1 %vm1135_vm6, %v8369_v18 }
 0x134   : > { %5693 = vmatmul.mubr.msk.bf16.gmra.mrb[16].mxu0 %vm1135_vm6, %v8356_v63  ;;  %5832 = vmatprep.mubr.msk.bf16.mxu1 %vm1135_vm6, %v8370_v28 }
 0x135   : > { %5696 = vmatprep.mubr.msk.bf16.mxu0 %vm1135_vm6, %v8357_v4 }
 0x13b   : > { %5833 = vmatmul.mubr.msk.bf16.gmra.mrb[20].mxu1 %vm1135_vm6, %v8371_v57 }
 0x13c   : > { %5697 = vmatmul.mubr.msk.bf16.gmra.mrb[20].mxu0 %vm1135_vm6, %v8358_v32  ;;  %5836 = vmatprep.mubr.msk.bf16.mxu1 %vm1135_vm6, %v8372_v59 }
 0x13d   : > { %5700 = vmatprep.mubr.msk.bf16.mxu0 %vm1135_vm6, %v8359_v38 }
 0x143   : > { %5837 = vmatmul.mubr.msk.bf16.gmra.mrb[24].mxu1 %vm1135_vm6, %v7133_v61 }
 0x144   : > { %5701 = vmatmul.mubr.msk.bf16.gmra.mrb[24].mxu0 %vm1135_vm6, %v7131_v50  ;;  %5840 = vmatprep.mubr.msk.bf16.mxu1 %vm1135_vm6, %v7159_v10 }
 0x145   : > { %5704 = vmatprep.mubr.msk.bf16.mxu0 %vm1135_vm6, %v7169_v27 }
 0x14b   : > { %5841 = vmatmul.mubr.msk.bf16.gmra.mrb[28].mxu1 %vm1135_vm6, %v7288_v29 }
 0x14c   : > { %5705 = vmatmul.mubr.msk.bf16.gmra.mrb[28].mxu0 %vm1135_vm6, %v7370_v46  ;;  %5982 = vmatprep.mubr.msk.bf16.mxu1 %vm1135_vm6, %v8360_v14 }
 0x14d   : > { %5846 = vmatprep.mubr.msk.bf16.mxu0 %vm1135_vm6, %v6749_v49 }
 0x153   : > { %5983 = vmatmul.mubr.msk.bf16.vlgmr.msra.gmra.mrb[32].mxu1 %vm1135_vm6, %v8361_v20 }
 0x154   : > { %6015 = vmatpush3.bf16.msra.mxu1 %v4005_v16  ;;  %5847 = vmatmul.mubr.msk.bf16.vlgmr.msra.gmra.mrb[32].mxu0 %vm1135_vm6, %v6775_v8 }
 0x155   : > { %5986 = vmatprep.mubr.msk.bf16.mxu1 %vm1135_vm6, %v8362_v62  ;;  %5850 = vmatprep.mubr.msk.bf16.mxu0 %vm1135_vm6, %v6817_v56 }
 0x156   : > { %6514 = vmatprep.subr.msk.bf16.mxu1 %vm1184_vm0, %v5230_v41  ;;  %5879 = vmatpush3.bf16.msra.mxu0 %v3264_v7 }
 0x157   : > { %6510 = vmatprep.subr.msk.bf16.mxu0 %vm1184_vm0, %v5160_v31 }
 0x15b   : > { %5987 = vmatmul.mubr.msk.bf16.gmra.mrb[36].mxu1 %vm1135_vm6, %v8363_v9 }
 0x15c   : > { %5851 = vmatmul.mubr.msk.bf16.gmra.mrb[36].mxu0 %vm1135_vm6, %v6840_v23  ;;  %5990 = vmatprep.mubr.msk.bf16.mxu1 %vm1135_vm6, %v8364_v53 }
 0x15d   : > { %5854 = vmatprep.mubr.msk.bf16.mxu0 %vm1135_vm6, %v6873_v3 }
 0x163   : > { %5991 = vmatmul.mubr.msk.bf16.gmra.mrb[40].mxu1 %vm1135_vm6, %v8365_v19 }
 0x164   : > { %5855 = vmatmul.mubr.msk.bf16.gmra.mrb[40].mxu0 %vm1135_vm6, %v6906_v48  ;;  %5994 = vmatprep.mubr.msk.bf16.mxu1 %vm1135_vm6, %v8366_v51 }
 0x165   : > { %5858 = vmatprep.mubr.msk.bf16.mxu0 %vm1135_vm6, %v6941_v42 }
 0x16b   : > { %5995 = vmatmul.mubr.msk.bf16.gmra.mrb[44].mxu1 %vm1135_vm6, %v8367_v6 }
 0x16c   : > { %5859 = vmatmul.mubr.msk.bf16.gmra.mrb[44].mxu0 %vm1135_vm6, %v6964_v26  ;;  %5998 = vmatprep.mubr.msk.bf16.mxu1 %vm1135_vm6, %v8368_v12 }
 0x16d   : > { %5862 = vmatprep.mubr.msk.bf16.mxu0 %vm1135_vm6, %v8355_v44 }
 0x173   : > { %5999 = vmatmul.mubr.msk.bf16.gmra.mrb[48].mxu1 %vm1135_vm6, %v8369_v18 }
 0x174   : > { %5863 = vmatmul.mubr.msk.bf16.gmra.mrb[48].mxu0 %vm1135_vm6, %v8356_v63  ;;  %6002 = vmatprep.mubr.msk.bf16.mxu1 %vm1135_vm6, %v8370_v28 }
 0x175   : > { %5866 = vmatprep.mubr.msk.bf16.mxu0 %vm1135_vm6, %v8357_v4 }
 0x17b   : > { %6003 = vmatmul.mubr.msk.bf16.gmra.mrb[52].mxu1 %vm1135_vm6, %v8371_v57 }
 0x17c   : > { %5867 = vmatmul.mubr.msk.bf16.gmra.mrb[52].mxu0 %vm1135_vm6, %v8358_v32  ;;  %6006 = vmatprep.mubr.msk.bf16.mxu1 %vm1135_vm6, %v8372_v59 }
 0x17d   : > { %5870 = vmatprep.mubr.msk.bf16.mxu0 %vm1135_vm6, %v8359_v38 }
 0x183   : > { %6007 = vmatmul.mubr.msk.bf16.gmra.mrb[56].mxu1 %vm1135_vm6, %v7133_v61 }
 0x184   : > { %5871 = vmatmul.mubr.msk.bf16.gmra.mrb[56].mxu0 %vm1135_vm6, %v7131_v50  ;;  %6010 = vmatprep.mubr.msk.bf16.mxu1 %vm1135_vm6, %v7159_v10 }
 0x185   : > { %5874 = vmatprep.mubr.msk.bf16.mxu0 %vm1135_vm6, %v7169_v27 }
 0x18b   : > { %6011 = vmatmul.mubr.msk.bf16.gmra.mrb[60].mxu1 %vm1135_vm6, %v7288_v29 }
 0x18c   : > { %5875 = vmatmul.mubr.msk.bf16.gmra.mrb[60].mxu0 %vm1135_vm6, %v7370_v46  ;;  %6016 = vmatprep.mubr.msk.bf16.mxu1 %vm1135_vm6, %v6749_v49  ;;  %v5178_v49 = vld [vmem:[%s8294_s2 + $0x16] sm:$0x3] }
 0x18d   : > { %5880 = vmatprep.mubr.msk.bf16.mxu0 %vm1135_vm6, %v7197_v25  ;;  %v4375_v25 = vsel %vm1184_vm0, %v5247_v21, 0  ;;  %v3641_v14 = vsel %vm1184_vm0, %v5178_v49, 0 }
 0x193   : > { %6017 = vmatmul.mubr.msk.bf16.vlgmr.msra.gmra.mrb[32].mxu1 %vm1135_vm6, %v6775_v8 }
 0x194   : > { %6049 = vmatpush3.bf16.msra.mxu1 %v4171_v34  ;;  %5881 = vmatmul.mubr.msk.bf16.vlgmr.msra.gmra.mrb[32].mxu0 %vm1135_vm6, %v7201_v60  ;;  %v868_v34 = vshll.u32 %v7667_v40, 16 }
 0x195   : > { %6020 = vmatprep.mubr.msk.bf16.mxu1 %vm1135_vm6, %v6817_v56  ;;  %5884 = vmatprep.mubr.msk.bf16.mxu0 %vm1135_vm6, %v7223_v5 }
 0x196   : > { %6515 = vmatprep.subr.msk.bf16.mxu1 %vm1184_vm0, %v5247_v21  ;;  %5913 = vmatpush3.bf16.msra.mxu0 %v3437_v55  ;;  %v872_v21 = vshrl.u32 %v7667_v40, 16 }
 0x197   : > { %6511 = vmatprep.subr.msk.bf16.mxu0 %vm1184_vm0, %v5178_v49 }
 0x19b   : > { %6021 = vmatmul.mubr.msk.bf16.gmra.mrb[36].mxu1 %vm1135_vm6, %v6840_v23 }
 0x19c   : > { %5885 = vmatmul.mubr.msk.bf16.gmra.mrb[36].mxu0 %vm1135_vm6, %v7227_v33  ;;  %6024 = vmatprep.mubr.msk.bf16.mxu1 %vm1135_vm6, %v6873_v3 }
 0x19d   : > { %5888 = vmatprep.mubr.msk.bf16.mxu0 %vm1135_vm6, %v7239_v43 }
 0x1a3   : > { %6025 = vmatmul.mubr.msk.bf16.gmra.mrb[40].mxu1 %vm1135_vm6, %v6906_v48 }
 0x1a4   : > { %5889 = vmatmul.mubr.msk.bf16.gmra.mrb[40].mxu0 %vm1135_vm6, %v7147_v17  ;;  %6028 = vmatprep.mubr.msk.bf16.mxu1 %vm1135_vm6, %v6941_v42 }
 0x1a5   : > { %5892 = vmatprep.mubr.msk.bf16.mxu0 %vm1135_vm6, %v7151_v36 }
 0x1ab   : > { %6029 = vmatmul.mubr.msk.bf16.gmra.mrb[44].mxu1 %vm1135_vm6, %v6964_v26 }
 0x1ac   : > { %5893 = vmatmul.mubr.msk.bf16.gmra.mrb[44].mxu0 %vm1135_vm6, %v7155_v47  ;;  %6032 = vmatprep.mubr.msk.bf16.mxu1 %vm1135_vm6, %v8355_v44 }
 0x1ad   : > { %5896 = vmatprep.mubr.msk.bf16.mxu0 %vm1135_vm6, %v7163_v0 }
 0x1b3   : > { %6033 = vmatmul.mubr.msk.bf16.gmra.mrb[48].mxu1 %vm1135_vm6, %v8356_v63 }
 0x1b4   : > { %5897 = vmatmul.mubr.msk.bf16.gmra.mrb[48].mxu0 %vm1135_vm6, %v7167_v22  ;;  %6036 = vmatprep.mubr.msk.bf16.mxu1 %vm1135_vm6, %v8357_v4 }
 0x1b5   : > { %5900 = vmatprep.mubr.msk.bf16.mxu0 %vm1135_vm6, %v7173_v54 }
 0x1bb   : > { %6037 = vmatmul.mubr.msk.bf16.gmra.mrb[52].mxu1 %vm1135_vm6, %v8358_v32 }
 0x1bc   : > { %5901 = vmatmul.mubr.msk.bf16.gmra.mrb[52].mxu0 %vm1135_vm6, %v7177_v2  ;;  %6040 = vmatprep.mubr.msk.bf16.mxu1 %vm1135_vm6, %v8359_v38 }
 0x1bd   : > { %5904 = vmatprep.mubr.msk.bf16.mxu0 %vm1135_vm6, %v7181_v30 }
 0x1c3   : > { %6041 = vmatmul.mubr.msk.bf16.gmra.mrb[56].mxu1 %vm1135_vm6, %v7131_v50 }
 0x1c4   : > { %5905 = vmatmul.mubr.msk.bf16.gmra.mrb[56].mxu0 %vm1135_vm6, %v7187_v37  ;;  %6044 = vmatprep.mubr.msk.bf16.mxu1 %vm1135_vm6, %v7169_v27 }
 0x1c5   : > { %5908 = vmatprep.mubr.msk.bf16.mxu0 %vm1135_vm6, %v7190_v35 }
 0x1cb   : > { %6045 = vmatmul.mubr.msk.bf16.gmra.mrb[60].mxu1 %vm1135_vm6, %v7370_v46 }
 0x1cc   : > { %5909 = vmatmul.mubr.msk.bf16.gmra.mrb[60].mxu0 %vm1135_vm6, %v7373_v15  ;;  %6050 = vmatprep.mubr.msk.bf16.mxu1 %vm1135_vm6, %v6775_v8 }
 0x1cd   : > { %5914 = vmatprep.mubr.msk.bf16.mxu0 %vm1135_vm6, %v7201_v60 }
 0x1d3   : > { %6051 = vmatmul.mubr.msk.bf16.vlgmr.msra.gmra.mrb[32].mxu1 %vm1135_vm6, %v6817_v56 }
 0x1d4   : > { %6083 = vmatpush3.bf16.msra.mxu1 %v4375_v25  ;;  %5915 = vmatmul.mubr.msk.bf16.vlgmr.msra.gmra.mrb[32].mxu0 %vm1135_vm6, %v7223_v5 }
 0x1d5   : > { %6054 = vmatprep.mubr.msk.bf16.mxu1 %vm1135_vm6, %v6840_v23  ;;  %5918 = vmatprep.mubr.msk.bf16.mxu0 %vm1135_vm6, %v7227_v33 }
 0x1d6   : > { %5947 = vmatpush3.bf16.msra.mxu0 %v3641_v14 }
 0x1db   : > { %6055 = vmatmul.mubr.msk.bf16.gmra.mrb[36].mxu1 %vm1135_vm6, %v6873_v3 }
 0x1dc   : > { %5919 = vmatmul.mubr.msk.bf16.gmra.mrb[36].mxu0 %vm1135_vm6, %v7239_v43  ;;  %6058 = vmatprep.mubr.msk.bf16.mxu1 %vm1135_vm6, %v6906_v48 }
 0x1dd   : > { %5922 = vmatprep.mubr.msk.bf16.mxu0 %vm1135_vm6, %v7147_v17 }
 0x1e3   : > { %6059 = vmatmul.mubr.msk.bf16.gmra.mrb[40].mxu1 %vm1135_vm6, %v6941_v42 }
 0x1e4   : > { %5923 = vmatmul.mubr.msk.bf16.gmra.mrb[40].mxu0 %vm1135_vm6, %v7151_v36  ;;  %6062 = vmatprep.mubr.msk.bf16.mxu1 %vm1135_vm6, %v6964_v26 }
 0x1e5   : > { %5926 = vmatprep.mubr.msk.bf16.mxu0 %vm1135_vm6, %v7155_v47 }
 0x1e6   : > { %v5814_v60 = vpop.f32.mrb[0].mxu1 }
 0x1e7   : > { %2900 = vrot.lane.b32.xlu1 %v5814_v60, %s6576_s11  ;;  %v2705_v5 = vpop.f32.mrb[1].mxu1  ;;  %v7638_v33 = vpop.f32.mrb[0].mxu0 }
 0x1e8   : > { %2896 = vrot.lane.b32.xlu0 %v2705_v5, %s6576_s11  ;;  %v5815_v17 = vpop.f32.mrb[2].mxu1  ;;  %v7641_v43 = vpop.f32.mrb[1].mxu0 }
 0x1e9   : > { %v2708_v24 = vpop.f32.mrb[3].mxu1  ;;  %v7643_v36 = vpop.f32.mrb[2].mxu0 }
 0x1ea   : > { %v7645_v58 = vpop.f32.mrb[3].mxu0 }
 0x1eb   : > { %6063 = vmatmul.mubr.msk.bf16.gmra.mrb[44].mxu1 %vm1135_vm6, %v8355_v44  ;;  %2902 = vrot.lane.b32.xlu1 %v5815_v17, %s6576_s11  ;;  %v870_v17 = vrot.slane %v868_v34, 5 }
 0x1ec   : > { %2898 = vrot.lane.b32.xlu0 %v2708_v24, %s6576_s11  ;;  %5927 = vmatmul.mubr.msk.bf16.gmra.mrb[44].mxu0 %vm1135_vm6, %v7163_v0  ;;  %v7665_v0 = vld [vmem:[#allocation2 + $0xcc] sm:$0xf]  ;;  %v874_v24 = vrot.slane %v872_v21, 4 }
 0x1ed   : > { %6066 = vmatprep.mubr.msk.bf16.mxu1 %vm1135_vm6, %v8356_v63  ;;  %5930 = vmatprep.mubr.msk.bf16.mxu0 %vm1135_vm6, %v7167_v22  ;;  %v859_v22 = vshrl.u32 %v7665_v0, 16  ;;  %v862_v45 = vshll.u32 %v7665_v0, 16  ;;  %v5161_v13 = vcombine.low %v7665_v0, %v7667_v40 }
 0x1ee   : > { %v5818_v47 = vpop.f32.mrb[4].mxu1 }
 0x1ef   : > { %v2721_v52 = vpop.f32.mrb[5].mxu1  ;;  %v7657_v1 = vpop.f32.mrb[4].mxu0  ;;  %v861_v60 = vrot.slane %v859_v22, 4  ;;  %v864_v5 = vrot.slane %v862_v45, 5  ;;  %v875_v22 = vor.u32 %v874_v24, %v870_v17 }
 0x1f0   : > { %2908 = vrot.lane.b32.xlu0 %v5818_v47, %s6576_s11  ;;  %v5819_v16 = vpop.f32.mrb[6].mxu1  ;;  %v7660_v41 = vpop.f32.mrb[5].mxu0 }
 0x1f1   : > { %2910 = vrot.lane.b32.xlu1 %v5819_v16, %s6576_s11  ;;  %v2724_v7 = vpop.f32.mrb[7].mxu1  ;;  %v7663_v31 = vpop.f32.mrb[6].mxu0  ;;  %v7693_v16 = vld [vmem:[#allocation2 + $0xd4] sm:$0x1] }
 0x1f2   : > { %v7669_v39 = vpop.f32.mrb[7].mxu0  ;;  %v878_v45 = vshll.u32 %v7693_v16, 16 }
 0x1f3   : > { %6067 = vmatmul.mubr.msk.bf16.gmra.mrb[48].mxu1 %vm1135_vm6, %v8357_v4 }
 0x1f4   : > { %2904 = vrot.lane.b32.xlu0 %v2721_v52, %s6576_s11  ;;  %5931 = vmatmul.mubr.msk.bf16.gmra.mrb[48].mxu0 %vm1135_vm6, %v7173_v54 }
 0x1f5   : > { %2906 = vrot.lane.b32.xlu1 %v2724_v7, %s6576_s11  ;;  %6070 = vmatprep.mubr.msk.bf16.mxu1 %vm1135_vm6, %v8358_v32  ;;  %v865_v7 = vor.u32 %v864_v5, %v861_v60  ;;  %v876_v60 = vrot.slane %v875_v22, 4  ;;  %v880_v5 = vrot.slane %v878_v45, 5 }
 0x1f6   : > { %v5822_v55 = vpop.f32.mrb[8].mxu1  ;;  %5934 = vmatprep.mubr.msk.bf16.mxu0 %vm1135_vm6, %v7177_v2 }
 0x1f7   : > { %v2737_v49 = vpop.f32.mrb[9].mxu1  ;;  %v7685_v25 = vpop.f32.mrb[8].mxu0 }
 0x1f8   : > { %2916 = vrot.lane.b32.xlu0 %v5822_v55, %s6576_s11  ;;  %v5823_v54 = vpop.f32.mrb[10].mxu1  ;;  %v7688_v14 = vpop.f32.mrb[9].mxu0 }
 0x1f9   : > { %2918 = vrot.lane.b32.xlu1 %v5823_v54, %s6576_s11  ;;  %v2740_v47 = vpop.f32.mrb[11].mxu1  ;;  %v7691_v52 = vpop.f32.mrb[10].mxu0  ;;  %v866_v54 = vrot.slane %v865_v7, 4  ;;  %v881_v7 = vsel %vm6720_vm9, %v876_v60, %v880_v5 }
 0x1fa   : > { %v7695_v2 = vpop.f32.mrb[11].mxu0 }
 0x1fb   : > { %8373 = vst [vmem:[#allocation12_spill] sm:$0xff] %v7695_v2  ;;  %6071 = vmatmul.mubr.msk.bf16.gmra.mrb[52].mxu1 %vm1135_vm6, %v8359_v38 }
 0x1fc   : > { %2912 = vrot.lane.b32.xlu0 %v2737_v49, %s6576_s11  ;;  %5935 = vmatmul.mubr.msk.bf16.gmra.mrb[52].mxu0 %vm1135_vm6, %v7181_v30 }
 0x1fd   : > { %2914 = vrot.lane.b32.xlu1 %v2740_v47, %s6576_s11  ;;  %6074 = vmatprep.mubr.msk.bf16.mxu1 %vm1135_vm6, %v7131_v50 }
 0x1fe   : > { %v5826_v34 = vpop.f32.mrb[12].mxu1  ;;  %5938 = vmatprep.mubr.msk.bf16.mxu0 %vm1135_vm6, %v7187_v37  ;;  %v871_v37 = vsel %vm6720_vm9, %v866_v54, %v870_v17 }
 0x1ff   : > { %v2753_v21 = vpop.f32.mrb[13].mxu1  ;;  %v7708_v55 = vpop.f32.mrb[12].mxu0 }
 0x200   : > { %2924 = vrot.lane.b32.xlu0 %v5826_v34, %s6576_s11  ;;  %v5827_v49 = vpop.f32.mrb[14].mxu1  ;;  %v7711_v30 = vpop.f32.mrb[13].mxu0 }
 0x201   : > { %2926 = vrot.lane.b32.xlu1 %v5827_v49, %s6576_s11  ;;  %v2756_v24 = vpop.f32.mrb[15].mxu1  ;;  %v7714_v47 = vpop.f32.mrb[14].mxu0 }
 0x202   : > { %v7716_v2 = vpop.f32.mrb[15].mxu0 }
 0x203   : > { %6075 = vmatmul.mubr.msk.bf16.gmra.mrb[56].mxu1 %vm1135_vm6, %v7169_v27 }
 0x204   : > { %2920 = vrot.lane.b32.xlu0 %v2753_v21, %s6576_s11  ;;  %5939 = vmatmul.mubr.msk.bf16.gmra.mrb[56].mxu0 %vm1135_vm6, %v7190_v35  ;;  %v7734_v21 = vcombine.low %v871_v37, %v881_v7 }
 0x205   : > { %2922 = vrot.lane.b32.xlu1 %v2756_v24, %s6576_s11  ;;  %6078 = vmatprep.mubr.msk.bf16.mxu1 %vm1135_vm6, %v7370_v46 }
 0x206   : > { %v5830_v22 = vpop.f32.mrb[16].mxu1  ;;  %5942 = vmatprep.mubr.msk.bf16.mxu0 %vm1135_vm6, %v7373_v15 }
 0x207   : > { %v2769_v45 = vpop.f32.mrb[17].mxu1  ;;  %v7732_v34 = vpop.f32.mrb[16].mxu0 }
 0x208   : > { %2932 = vrot.lane.b32.xlu0 %v5830_v22, %s6576_s11  ;;  %v5831_v35 = vpop.f32.mrb[18].mxu1  ;;  %v7737_v17 = vpop.f32.mrb[17].mxu0 }
 0x209   : > { %2934 = vrot.lane.b32.xlu1 %v5831_v35, %s6576_s11  ;;  %v2772_v49 = vpop.f32.mrb[19].mxu1  ;;  %v7742_v54 = vpop.f32.mrb[18].mxu0 }
 0x20a   : > { %v7744_v60 = vpop.f32.mrb[19].mxu0 }
 0x20b   : > { %6079 = vmatmul.mubr.msk.bf16.gmra.mrb[60].mxu1 %vm1135_vm6, %v7734_v21 }
 0x20c   : > { %2928 = vrot.lane.b32.xlu0 %v2769_v45, %s6576_s11  ;;  %5943 = vmatmul.mubr.msk.bf16.gmra.mrb[60].mxu0 %vm1135_vm6, %v5161_v13 }
 0x20d   : > { %2930 = vrot.lane.b32.xlu1 %v2772_v49, %s6576_s11  ;;  %6084 = vmatprep.mubr.msk.bf16.mxu1 %vm1135_vm6, %v8361_v20 }
 0x20e   : > { %v5834_v15 = vpop.f32.mrb[20].mxu1  ;;  %5948 = vmatprep.mubr.msk.bf16.mxu0 %vm1135_vm6, %v6775_v8 }
 0x20f   : > { %v2785_v0 = vpop.f32.mrb[21].mxu1  ;;  %v7755_v5 = vpop.f32.mrb[20].mxu0 }
 0x210   : > { %2940 = vrot.lane.b32.xlu0 %v5834_v15, %s6576_s11  ;;  %v5835_v24 = vpop.f32.mrb[22].mxu1  ;;  %v7758_v37 = vpop.f32.mrb[21].mxu0 }
 0x211   : > { %2942 = vrot.lane.b32.xlu1 %v5835_v24, %s6576_s11  ;;  %v2788_v7 = vpop.f32.mrb[23].mxu1  ;;  %v7761_v22 = vpop.f32.mrb[22].mxu0 }
 0x212   : > { %v7763_v45 = vpop.f32.mrb[23].mxu0 }
 0x213   : > { %6085 = vmatmul.mubr.msk.bf16.vlgmr.msra.gmra.mrb[32].mxu1 %vm1135_vm6, %v8362_v62 }
 0x214   : > { %2936 = vrot.lane.b32.xlu0 %v2785_v0, %s6576_s11  ;;  %5949 = vmatmul.mubr.msk.bf16.vlgmr.msra.gmra.mrb[32].mxu0 %vm1135_vm6, %v6817_v56 }
 0x215   : > { %2938 = vrot.lane.b32.xlu1 %v2788_v7, %s6576_s11  ;;  %6088 = vmatprep.mubr.msk.bf16.mxu1 %vm1135_vm6, %v8363_v9 }
 0x216   : > { %v5838_v8 = vpop.f32.mrb[24].mxu1  ;;  %5952 = vmatprep.mubr.msk.bf16.mxu0 %vm1135_vm6, %v6840_v23 }
 0x217   : > { %v2801_v20 = vpop.f32.mrb[25].mxu1  ;;  %v7775_v35 = vpop.f32.mrb[24].mxu0 }
 0x218   : > { %2948 = vrot.lane.b32.xlu0 %v5838_v8, %s6576_s11  ;;  %v5839_v62 = vpop.f32.mrb[26].mxu1  ;;  %v7778_v13 = vpop.f32.mrb[25].mxu0 }
 0x219   : > { %2950 = vrot.lane.b32.xlu1 %v5839_v62, %s6576_s11  ;;  %v2804_v56 = vpop.f32.mrb[27].mxu1  ;;  %v7781_v49 = vpop.f32.mrb[26].mxu0 }
 0x21a   : > { %v7783_v15 = vpop.f32.mrb[27].mxu0 }
 0x21b   : > { %6089 = vmatmul.mubr.msk.bf16.gmra.mrb[36].mxu1 %vm1135_vm6, %v8364_v53 }
 0x21c   : > { %2944 = vrot.lane.b32.xlu0 %v2801_v20, %s6576_s11  ;;  %5953 = vmatmul.mubr.msk.bf16.gmra.mrb[36].mxu0 %vm1135_vm6, %v6873_v3 }
 0x21d   : > { %2946 = vrot.lane.b32.xlu1 %v2804_v56, %s6576_s11  ;;  %6092 = vmatprep.mubr.msk.bf16.mxu1 %vm1135_vm6, %v8365_v19 }
 0x21e   : > { %v5842_v23 = vpop.f32.mrb[28].mxu1  ;;  %5956 = vmatprep.mubr.msk.bf16.mxu0 %vm1135_vm6, %v6906_v48  ;;  %v1078_v48 = vrot.slane %v7667_v40, 5 }
 0x21f   : > { %v2817_v9 = vpop.f32.mrb[29].mxu1  ;;  %v7795_v0 = vpop.f32.mrb[28].mxu0 }
 0x220   : > { %2956 = vrot.lane.b32.xlu0 %v5842_v23, %s6576_s11  ;;  %v5843_v53 = vpop.f32.mrb[30].mxu1  ;;  %v7798_v24 = vpop.f32.mrb[29].mxu0 }
 0x221   : > { %2958 = vrot.lane.b32.xlu1 %v5843_v53, %s6576_s11  ;;  %v2820_v3 = vpop.f32.mrb[31].mxu1  ;;  %v7801_v7 = vpop.f32.mrb[30].mxu0 }
 0x222   : > { %v7803_v8 = vpop.f32.mrb[31].mxu0 }
 0x223   : > { %6093 = vmatmul.mubr.msk.bf16.gmra.mrb[40].mxu1 %vm1135_vm6, %v8366_v51 }
 0x224   : > { %2952 = vrot.lane.b32.xlu0 %v2817_v9, %s6576_s11  ;;  %5957 = vmatmul.mubr.msk.bf16.gmra.mrb[40].mxu0 %vm1135_vm6, %v6941_v42  ;;  %v899_v42 = vld [vmem:[#allocation2 + $0xcc] sm:$0xe] }
 0x225   : > { %2954 = vrot.lane.b32.xlu1 %v2820_v3, %s6576_s11  ;;  %6096 = vmatprep.mubr.msk.bf16.mxu1 %vm1135_vm6, %v8367_v6 }
 0x226   : > { %5960 = vmatprep.mubr.msk.bf16.mxu0 %vm1135_vm6, %v6964_v26  ;;  %v4938_v26 = vrot.slane %v899_v42, 9  ;;  %v8374_v42 = vld [vmem:[#allocation12_spill] sm:$0xff] }
 0x22b   : > { %6097 = vmatmul.mubr.msk.bf16.gmra.mrb[44].mxu1 %vm1135_vm6, %v8368_v12 }
 0x22c   : > { %5961 = vmatmul.mubr.msk.bf16.gmra.mrb[44].mxu0 %vm1135_vm6, %v8355_v44  ;;  %6100 = vmatprep.mubr.msk.bf16.mxu1 %vm1135_vm6, %v8369_v18  ;;  %v1080_v44 = vrot.slane %v1078_v48, 4 }
 0x22d   : > { %5964 = vmatprep.mubr.msk.bf16.mxu0 %vm1135_vm6, %v8356_v63  ;;  %v1081_v63 = vrot.slane %v7693_v16, 5 }
 0x233   : > { %6101 = vmatmul.mubr.msk.bf16.gmra.mrb[48].mxu1 %vm1135_vm6, %v8370_v28 }
 0x234   : > { %5965 = vmatmul.mubr.msk.bf16.gmra.mrb[48].mxu0 %vm1135_vm6, %v8357_v4  ;;  %6104 = vmatprep.mubr.msk.bf16.mxu1 %vm1135_vm6, %v8371_v57 }
 0x235   : > { %5968 = vmatprep.mubr.msk.bf16.mxu0 %vm1135_vm6, %v8358_v32 }
 0x23b   : > { %6105 = vmatmul.mubr.msk.bf16.gmra.mrb[52].mxu1 %vm1135_vm6, %v8372_v59 }
 0x23c   : > { %5969 = vmatmul.mubr.msk.bf16.gmra.mrb[52].mxu0 %vm1135_vm6, %v8359_v38  ;;  %6108 = vmatprep.mubr.msk.bf16.mxu1 %vm1135_vm6, %v7133_v61  ;;  %v1079_v61 = vsel %vm6655_vm5, %v4938_v26, %v1078_v48 }
 0x23d   : > { %5972 = vmatprep.mubr.msk.bf16.mxu0 %vm1135_vm6, %v7131_v50  ;;  %v1082_v50 = vsel %vm6655_vm5, %v1080_v44, %v1081_v63 }
 0x23e   : > { %v5248_v4 = vcombine.low %v1079_v61, %v1082_v50 }
 0x243   : > { %6109 = vmatmul.mubr.msk.bf16.gmra.mrb[56].mxu1 %vm1135_vm6, %v7159_v10  ;;  %v7860_v10 = vld [vmem:[%s8295_s3] ss:$0 sm:$0xff] }
 0x244   : > { %5973 = vmatmul.mubr.msk.bf16.gmra.mrb[56].mxu0 %vm1135_vm6, %v7169_v27  ;;  %6112 = vmatprep.mubr.msk.bf16.mxu1 %vm1135_vm6, %v7288_v29 }
 0x245   : > { %5976 = vmatprep.mubr.msk.bf16.mxu0 %vm1135_vm6, %v7370_v46 }
 0x24b   : > { %6113 = vmatmul.mubr.msk.bf16.gmra.mrb[60].mxu1 %vm1135_vm6, %v5248_v4 }
 0x24c   : > { %5977 = vmatmul.mubr.msk.bf16.gmra.mrb[60].mxu0 %vm1135_vm6, %v7734_v21 }
 0x259   : > { %v2901_v27 = vpop.permute.xlu1 %2900 }
 0x25a   : > { %v2994_v11 = vsel %vm1135_vm6, %v7638_v33, %v2901_v27  ;;  %v2897_v32 = vpop.permute.xlu0 %2896 }
 0x25b   : > { %v3032_v38 = vadd.f32 %v7860_v10, %v2994_v11  ;;  %v2992_v29 = vsel %vm1135_vm6, %v7641_v43, %v2897_v32 }
 0x25c   : > { %v3030_v46 = vadd.f32 %v7860_v10, %v2992_v29 }
 0x25d   : > { %3065 = vst.msk [vmem:[%s7865_s21 + $0x20] sm:$0xff] %vm3062_vm10, %v3032_v38  ;;  %v2903_v19 = vpop.permute.xlu1 %2902 }
 0x25e   : > { %3063 = vst.msk [vmem:[%s7865_s21] sm:$0xff] %vm3062_vm10, %v3030_v46  ;;  %v2995_v51 = vsel %vm1135_vm6, %v7643_v36, %v2903_v19  ;;  %v2899_v6 = vpop.permute.xlu0 %2898 }
 0x25f   : > { %v3033_v12 = vadd.f32 %v7860_v10, %v2995_v51  ;;  %v2993_v18 = vsel %vm1135_vm6, %v7645_v58, %v2899_v6 }
 0x260   : > { %v3031_v28 = vadd.f32 %v7860_v10, %v2993_v18 }
 0x261   : > { %3066 = vst.msk [vmem:[%s7865_s21 + $0x28] sm:$0xff] %vm3062_vm10, %v3033_v12 }
 0x262   : > { %3064 = vst.msk [vmem:[%s7865_s21 + $0x8] sm:$0xff] %vm3062_vm10, %v3031_v28  ;;  %v2909_v57 = vpop.permute.xlu0 %2908 }
 0x263   : > { %v2998_v59 = vsel %vm1135_vm6, %v7657_v1, %v2909_v57  ;;  %v2911_v33 = vpop.permute.xlu1 %2910 }
 0x264   : > { %v3036_v43 = vadd.f32 %v7860_v10, %v2998_v59  ;;  %v2999_v36 = vsel %vm1135_vm6, %v7663_v31, %v2911_v33 }
 0x265   : > { %v3037_v58 = vadd.f32 %v7860_v10, %v2999_v36 }
 0x266   : > { %3069 = vst.msk [vmem:[%s7865_s21 + $0x60] sm:$0xff] %vm3062_vm10, %v3036_v43  ;;  %v2905_v40 = vpop.permute.xlu0 %2904 }
 0x267   : > { %3070 = vst.msk [vmem:[%s7865_s21 + $0x68] sm:$0xff] %vm3062_vm10, %v3037_v58  ;;  %v2996_v16 = vsel %vm1135_vm6, %v7660_v41, %v2905_v40  ;;  %v2907_v21 = vpop.permute.xlu1 %2906 }
 0x268   : > { %v3034_v1 = vadd.f32 %v7860_v10, %v2996_v16  ;;  %v2997_v20 = vsel %vm1135_vm6, %v7669_v39, %v2907_v21 }
 0x269   : > { %v3035_v31 = vadd.f32 %v7860_v10, %v2997_v20 }
 0x26a   : > { %3067 = vst.msk [vmem:[%s7865_s21 + $0x40] sm:$0xff] %vm3062_vm10, %v3034_v1  ;;  %v2917_v62 = vpop.permute.xlu0 %2916 }
 0x26b   : > { %3068 = vst.msk [vmem:[%s7865_s21 + $0x48] sm:$0xff] %vm3062_vm10, %v3035_v31  ;;  %v3002_v56 = vsel %vm1135_vm6, %v7685_v25, %v2917_v62  ;;  %v2919_v23 = vpop.permute.xlu1 %2918 }
 0x26c   : > { %v3040_v41 = vadd.f32 %v7860_v10, %v3002_v56  ;;  %v3003_v9 = vsel %vm1135_vm6, %v7691_v52, %v2919_v23 }
 0x26d   : > { %v3041_v39 = vadd.f32 %v7860_v10, %v3003_v9 }
 0x26e   : > { %3073 = vst.msk [vmem:[%s7865_s21 + $0xa0] sm:$0xff] %vm3062_vm10, %v3040_v41  ;;  %v2913_v53 = vpop.permute.xlu0 %2912 }
 0x26f   : > { %3074 = vst.msk [vmem:[%s7865_s21 + $0xa8] sm:$0xff] %vm3062_vm10, %v3041_v39  ;;  %v3000_v3 = vsel %vm1135_vm6, %v7688_v14, %v2913_v53  ;;  %v2915_v48 = vpop.permute.xlu1 %2914 }
 0x270   : > { %v3038_v25 = vadd.f32 %v7860_v10, %v3000_v3  ;;  %v3001_v26 = vsel %vm1135_vm6, %v8374_v42, %v2915_v48 }
 0x271   : > { %v3039_v52 = vadd.f32 %v7860_v10, %v3001_v26 }
 0x272   : > { %3071 = vst.msk [vmem:[%s7865_s21 + $0x80] sm:$0xff] %vm3062_vm10, %v3038_v25  ;;  %v2925_v44 = vpop.permute.xlu0 %2924 }
 0x273   : > { %3072 = vst.msk [vmem:[%s7865_s21 + $0x88] sm:$0xff] %vm3062_vm10, %v3039_v52  ;;  %v3006_v63 = vsel %vm1135_vm6, %v7708_v55, %v2925_v44  ;;  %v2927_v61 = vpop.permute.xlu1 %2926 }
 0x274   : > { %v3044_v14 = vadd.f32 %v7860_v10, %v3006_v63  ;;  %v3007_v50 = vsel %vm1135_vm6, %v7714_v47, %v2927_v61 }
 0x275   : > { %v3045_v4 = vadd.f32 %v7860_v10, %v3007_v50 }
 0x276   : > { %3077 = vst.msk [vmem:[%s7865_s21 + $0xe0] sm:$0xff] %vm3062_vm10, %v3044_v14  ;;  %v2921_v27 = vpop.permute.xlu0 %2920 }
 0x277   : > { %3078 = vst.msk [vmem:[%s7865_s21 + $0xe8] sm:$0xff] %vm3062_vm10, %v3045_v4  ;;  %v3004_v11 = vsel %vm1135_vm6, %v7711_v30, %v2921_v27  ;;  %v2923_v32 = vpop.permute.xlu1 %2922 }
 0x278   : > { %v3042_v55 = vadd.f32 %v7860_v10, %v3004_v11  ;;  %v3005_v38 = vsel %vm1135_vm6, %v7716_v2, %v2923_v32 }
 0x279   : > { %v3043_v47 = vadd.f32 %v7860_v10, %v3005_v38 }
 0x27a   : > { %3075 = vst.msk [vmem:[%s7865_s21 + $0xc0] sm:$0xff] %vm3062_vm10, %v3042_v55  ;;  %v2933_v29 = vpop.permute.xlu0 %2932 }
 0x27b   : > { %3076 = vst.msk [vmem:[%s7865_s21 + $0xc8] sm:$0xff] %vm3062_vm10, %v3043_v47  ;;  %v3010_v46 = vsel %vm1135_vm6, %v7732_v34, %v2933_v29  ;;  %v2935_v19 = vpop.permute.xlu1 %2934 }
 0x27c   : > { %v3048_v30 = vadd.f32 %v7860_v10, %v3010_v46  ;;  %v3011_v51 = vsel %vm1135_vm6, %v7742_v54, %v2935_v19 }
 0x27d   : > { %v3049_v2 = vadd.f32 %v7860_v10, %v3011_v51 }
 0x27e   : > { %3081 = vst.msk [vmem:[%s7865_s21 + $0x120] sm:$0xff] %vm3062_vm10, %v3048_v30  ;;  %v2929_v6 = vpop.permute.xlu0 %2928 }
 0x27f   : > { %3082 = vst.msk [vmem:[%s7865_s21 + $0x128] sm:$0xff] %vm3062_vm10, %v3049_v2  ;;  %v3008_v12 = vsel %vm1135_vm6, %v7737_v17, %v2929_v6  ;;  %v2931_v18 = vpop.permute.xlu1 %2930 }
 0x280   : > { %v3046_v34 = vadd.f32 %v7860_v10, %v3008_v12  ;;  %v3009_v28 = vsel %vm1135_vm6, %v7744_v60, %v2931_v18 }
 0x281   : > { %v3047_v54 = vadd.f32 %v7860_v10, %v3009_v28 }
 0x282   : > { %3079 = vst.msk [vmem:[%s7865_s21 + $0x100] sm:$0xff] %vm3062_vm10, %v3046_v34  ;;  %v2941_v57 = vpop.permute.xlu0 %2940 }
 0x283   : > { %3080 = vst.msk [vmem:[%s7865_s21 + $0x108] sm:$0xff] %vm3062_vm10, %v3047_v54  ;;  %v3014_v59 = vsel %vm1135_vm6, %v7755_v5, %v2941_v57  ;;  %v2943_v33 = vpop.permute.xlu1 %2942 }
 0x284   : > { %v3052_v17 = vadd.f32 %v7860_v10, %v3014_v59  ;;  %v3015_v43 = vsel %vm1135_vm6, %v7761_v22, %v2943_v33 }
 0x285   : > { %v3053_v60 = vadd.f32 %v7860_v10, %v3015_v43 }
 0x286   : > { %3085 = vst.msk [vmem:[%s7865_s21 + $0x160] sm:$0xff] %vm3062_vm10, %v3052_v17  ;;  %v2937_v36 = vpop.permute.xlu0 %2936 }
 0x287   : > { %3086 = vst.msk [vmem:[%s7865_s21 + $0x168] sm:$0xff] %vm3062_vm10, %v3053_v60  ;;  %v3012_v58 = vsel %vm1135_vm6, %v7758_v37, %v2937_v36  ;;  %v2939_v40 = vpop.permute.xlu1 %2938 }
 0x288   : > { %v3050_v5 = vadd.f32 %v7860_v10, %v3012_v58  ;;  %v3013_v16 = vsel %vm1135_vm6, %v7763_v45, %v2939_v40 }
 0x289   : > { %v3051_v22 = vadd.f32 %v7860_v10, %v3013_v16 }
 0x28a   : > { %3083 = vst.msk [vmem:[%s7865_s21 + $0x140] sm:$0xff] %vm3062_vm10, %v3050_v5  ;;  %v2949_v21 = vpop.permute.xlu0 %2948 }
 0x28b   : > { %3084 = vst.msk [vmem:[%s7865_s21 + $0x148] sm:$0xff] %vm3062_vm10, %v3051_v22  ;;  %v3018_v1 = vsel %vm1135_vm6, %v7775_v35, %v2949_v21  ;;  %v2951_v20 = vpop.permute.xlu1 %2950 }
 0x28c   : > { %v3056_v37 = vadd.f32 %v7860_v10, %v3018_v1  ;;  %v3019_v31 = vsel %vm1135_vm6, %v7781_v49, %v2951_v20 }
 0x28d   : > { %v3057_v45 = vadd.f32 %v7860_v10, %v3019_v31 }
 0x28e   : > { %3089 = vst.msk [vmem:[%s7865_s21 + $0x1a0] sm:$0xff] %vm3062_vm10, %v3056_v37  ;;  %v2945_v62 = vpop.permute.xlu0 %2944 }
 0x28f   : > { %3090 = vst.msk [vmem:[%s7865_s21 + $0x1a8] sm:$0xff] %vm3062_vm10, %v3057_v45  ;;  %v3016_v56 = vsel %vm1135_vm6, %v7778_v13, %v2945_v62  ;;  %v2947_v23 = vpop.permute.xlu1 %2946 }
 0x290   : > { %v3054_v35 = vadd.f32 %v7860_v10, %v3016_v56  ;;  %v3017_v41 = vsel %vm1135_vm6, %v7783_v15, %v2947_v23 }
 0x291   : > { %v3055_v49 = vadd.f32 %v7860_v10, %v3017_v41 }
 0x292   : > { %3087 = vst.msk [vmem:[%s7865_s21 + $0x180] sm:$0xff] %vm3062_vm10, %v3054_v35  ;;  %v2957_v9 = vpop.permute.xlu0 %2956 }
 0x293   : > { %3088 = vst.msk [vmem:[%s7865_s21 + $0x188] sm:$0xff] %vm3062_vm10, %v3055_v49  ;;  %v3022_v39 = vsel %vm1135_vm6, %v7795_v0, %v2957_v9  ;;  %v2959_v53 = vpop.permute.xlu1 %2958 }
 0x294   : > { %v3060_v13 = vadd.f32 %v7860_v10, %v3022_v39  ;;  %v3023_v3 = vsel %vm1135_vm6, %v7801_v7, %v2959_v53 }
 0x295   : > { %v3061_v15 = vadd.f32 %v7860_v10, %v3023_v3 }
 0x296   : > { %3093 = vst.msk [vmem:[%s7865_s21 + $0x1e0] sm:$0xff] %vm3062_vm10, %v3060_v13  ;;  %v2953_v48 = vpop.permute.xlu0 %2952 }
 0x297   : > { %3094 = vst.msk [vmem:[%s7865_s21 + $0x1e8] sm:$0xff] %vm3062_vm10, %v3061_v15  ;;  %v3020_v25 = vsel %vm1135_vm6, %v7798_v24, %v2953_v48  ;;  %v2955_v42 = vpop.permute.xlu1 %2954 }
 0x298   : > { %v3058_v26 = vadd.f32 %v7860_v10, %v3020_v25  ;;  %v3021_v0 = vsel %vm1135_vm6, %v7803_v8, %v2955_v42 }
 0x299   : > { %v3059_v52 = vadd.f32 %v7860_v10, %v3021_v0 }
 0x29a   : > { %3091 = vst.msk [vmem:[%s7865_s21 + $0x1c0] sm:$0xff] %vm3062_vm10, %v3058_v26 }
 0x29b   : > { %3092 = vst.msk [vmem:[%s7865_s21 + $0x1c8] sm:$0xff] %vm3062_vm10, %v3059_v52 }
 0x2e6   : > { %v6086_v7 = vpop.f32.mrb[32].mxu1 }
 0x2e7   : > { %4606 = vrot.lane.b32.xlu0 %v6086_v7, %s6576_s11  ;;  %v4411_v44 = vpop.f32.mrb[33].mxu1  ;;  %v8028_v63 = vpop.f32.mrb[32].mxu0 }
 0x2e8   : > { %v6087_v61 = vpop.f32.mrb[34].mxu1  ;;  %v8030_v24 = vpop.f32.mrb[33].mxu0 }
 0x2e9   : > { %4608 = vrot.lane.b32.xlu1 %v6087_v61, %s6576_s11  ;;  %v4414_v14 = vpop.f32.mrb[35].mxu1  ;;  %v8033_v50 = vpop.f32.mrb[34].mxu0 }
 0x2ea   : > { %v8035_v8 = vpop.f32.mrb[35].mxu0 }
 0x2eb   : > { %4602 = vrot.lane.b32.xlu0 %v4411_v44, %s6576_s11 }
 0x2ed   : > { %4604 = vrot.lane.b32.xlu1 %v4414_v14, %s6576_s11 }
 0x2ee   : > { %v6090_v4 = vpop.f32.mrb[36].mxu1 }
 0x2ef   : > { %4614 = vrot.lane.b32.xlu0 %v6090_v4, %s6576_s11  ;;  %v4427_v27 = vpop.f32.mrb[37].mxu1  ;;  %v8040_v11 = vpop.f32.mrb[36].mxu0 }
 0x2f0   : > { %v6091_v32 = vpop.f32.mrb[38].mxu1  ;;  %v8042_v55 = vpop.f32.mrb[37].mxu0 }
 0x2f1   : > { %4616 = vrot.lane.b32.xlu1 %v6091_v32, %s6576_s11  ;;  %v4430_v38 = vpop.f32.mrb[39].mxu1  ;;  %v8045_v47 = vpop.f32.mrb[38].mxu0 }
 0x2f2   : > { %v8047_v29 = vpop.f32.mrb[39].mxu0 }
 0x2f3   : > { %4610 = vrot.lane.b32.xlu0 %v4427_v27, %s6576_s11 }
 0x2f5   : > { %4612 = vrot.lane.b32.xlu1 %v4430_v38, %s6576_s11 }
 0x2f6   : > { %v6094_v46 = vpop.f32.mrb[40].mxu1 }
 0x2f7   : > { %4622 = vrot.lane.b32.xlu0 %v6094_v46, %s6576_s11  ;;  %v4443_v19 = vpop.f32.mrb[41].mxu1  ;;  %v8052_v30 = vpop.f32.mrb[40].mxu0 }
 0x2f8   : > { %v6095_v51 = vpop.f32.mrb[42].mxu1  ;;  %v8054_v2 = vpop.f32.mrb[41].mxu0 }
 0x2f9   : > { %4624 = vrot.lane.b32.xlu1 %v6095_v51, %s6576_s11  ;;  %v4446_v6 = vpop.f32.mrb[43].mxu1  ;;  %v8057_v12 = vpop.f32.mrb[42].mxu0 }
 0x2fa   : > { %v8059_v18 = vpop.f32.mrb[43].mxu0 }
 0x2fb   : > { %4618 = vrot.lane.b32.xlu0 %v4443_v19, %s6576_s11 }
 0x2fd   : > { %4620 = vrot.lane.b32.xlu1 %v4446_v6, %s6576_s11 }
 0x2fe   : > { %v6098_v34 = vpop.f32.mrb[44].mxu1 }
 0x2ff   : > { %4630 = vrot.lane.b32.xlu0 %v6098_v34, %s6576_s11  ;;  %v4459_v28 = vpop.f32.mrb[45].mxu1  ;;  %v8064_v54 = vpop.f32.mrb[44].mxu0 }
 0x300   : > { %v6099_v57 = vpop.f32.mrb[46].mxu1  ;;  %v8066_v59 = vpop.f32.mrb[45].mxu0 }
 0x301   : > { %4632 = vrot.lane.b32.xlu1 %v6099_v57, %s6576_s11  ;;  %v4462_v33 = vpop.f32.mrb[47].mxu1  ;;  %v8069_v17 = vpop.f32.mrb[46].mxu0 }
 0x302   : > { %v8071_v43 = vpop.f32.mrb[47].mxu0 }
 0x303   : > { %4626 = vrot.lane.b32.xlu0 %v4459_v28, %s6576_s11 }
 0x305   : > { %4628 = vrot.lane.b32.xlu1 %v4462_v33, %s6576_s11 }
 0x306   : > { %v6102_v60 = vpop.f32.mrb[48].mxu1 }
 0x307   : > { %4638 = vrot.lane.b32.xlu0 %v6102_v60, %s6576_s11  ;;  %v4475_v36 = vpop.f32.mrb[49].mxu1  ;;  %v8076_v58 = vpop.f32.mrb[48].mxu0 }
 0x308   : > { %v6103_v40 = vpop.f32.mrb[50].mxu1  ;;  %v8078_v5 = vpop.f32.mrb[49].mxu0 }
 0x309   : > { %4640 = vrot.lane.b32.xlu1 %v6103_v40, %s6576_s11  ;;  %v4478_v16 = vpop.f32.mrb[51].mxu1  ;;  %v8081_v22 = vpop.f32.mrb[50].mxu0 }
 0x30a   : > { %v8083_v21 = vpop.f32.mrb[51].mxu0 }
 0x30b   : > { %4634 = vrot.lane.b32.xlu0 %v4475_v36, %s6576_s11 }
 0x30d   : > { %4636 = vrot.lane.b32.xlu1 %v4478_v16, %s6576_s11 }
 0x30e   : > { %v6106_v1 = vpop.f32.mrb[52].mxu1 }
 0x30f   : > { %4646 = vrot.lane.b32.xlu0 %v6106_v1, %s6576_s11  ;;  %v4491_v20 = vpop.f32.mrb[53].mxu1  ;;  %v8088_v37 = vpop.f32.mrb[52].mxu0 }
 0x310   : > { %v6107_v31 = vpop.f32.mrb[54].mxu1  ;;  %v8090_v45 = vpop.f32.mrb[53].mxu0 }
 0x311   : > { %4648 = vrot.lane.b32.xlu1 %v6107_v31, %s6576_s11  ;;  %v4494_v62 = vpop.f32.mrb[55].mxu1  ;;  %v8093_v56 = vpop.f32.mrb[54].mxu0 }
 0x312   : > { %v8095_v23 = vpop.f32.mrb[55].mxu0 }
 0x313   : > { %4642 = vrot.lane.b32.xlu0 %v4491_v20, %s6576_s11 }
 0x315   : > { %4644 = vrot.lane.b32.xlu1 %v4494_v62, %s6576_s11 }
 0x316   : > { %v6110_v35 = vpop.f32.mrb[56].mxu1 }
 0x317   : > { %4654 = vrot.lane.b32.xlu0 %v6110_v35, %s6576_s11  ;;  %v4507_v41 = vpop.f32.mrb[57].mxu1  ;;  %v8100_v49 = vpop.f32.mrb[56].mxu0 }
 0x318   : > { %v6111_v9 = vpop.f32.mrb[58].mxu1  ;;  %v8102_v39 = vpop.f32.mrb[57].mxu0 }
 0x319   : > { %4656 = vrot.lane.b32.xlu1 %v6111_v9, %s6576_s11  ;;  %v4510_v53 = vpop.f32.mrb[59].mxu1  ;;  %v8105_v13 = vpop.f32.mrb[58].mxu0 }
 0x31a   : > { %v8107_v3 = vpop.f32.mrb[59].mxu0 }
 0x31b   : > { %4650 = vrot.lane.b32.xlu0 %v4507_v41, %s6576_s11 }
 0x31d   : > { %4652 = vrot.lane.b32.xlu1 %v4510_v53, %s6576_s11 }
 0x31e   : > { %v6114_v15 = vpop.f32.mrb[60].mxu1 }
 0x31f   : > { %v4523_v48 = vpop.f32.mrb[61].mxu1  ;;  %v8111_v25 = vpop.f32.mrb[60].mxu0 }
 0x320   : > { %4658 = vrot.lane.b32.xlu0 %v4523_v48, %s6576_s11  ;;  %v6115_v42 = vpop.f32.mrb[62].mxu1  ;;  %v8114_v26 = vpop.f32.mrb[61].mxu0 }
 0x321   : > { %v4526_v0 = vpop.f32.mrb[63].mxu1  ;;  %v8116_v52 = vpop.f32.mrb[62].mxu0 }
 0x322   : > { %4660 = vrot.lane.b32.xlu1 %v4526_v0, %s6576_s11  ;;  %v8119_v7 = vpop.f32.mrb[63].mxu0 }
 0x324   : > { %4662 = vrot.lane.b32.xlu0 %v6114_v15, %s6576_s11 }
 0x326   : > { %4664 = vrot.lane.b32.xlu1 %v6115_v42, %s6576_s11 }
 0x359   : > { %v4607_v44 = vpop.permute.xlu0 %4606 }
 0x35a   : > { %v4700_v61 = vsel %vm1135_vm6, %v8028_v63, %v4607_v44 }
 0x35b   : > { %v4732_v14 = vadd.f32 %v7860_v10, %v4700_v61  ;;  %v4609_v4 = vpop.permute.xlu1 %4608 }
 0x35c   : > { %v4701_v27 = vsel %vm1135_vm6, %v8033_v50, %v4609_v4 }
 0x35d   : > { %5267 = vst.msk [vmem:[%s7865_s21 + $0x30] sm:$0xff] %vm3062_vm10, %v4732_v14  ;;  %v4733_v32 = vadd.f32 %v7860_v10, %v4701_v27  ;;  %v4603_v38 = vpop.permute.xlu0 %4602 }
 0x35e   : > { %v4698_v46 = vsel %vm1135_vm6, %v8030_v24, %v4603_v38 }
 0x35f   : > { %5268 = vst.msk [vmem:[%s7865_s21 + $0x38] sm:$0xff] %vm3062_vm10, %v4733_v32  ;;  %v4730_v63 = vadd.f32 %v7860_v10, %v4698_v46  ;;  %v4605_v19 = vpop.permute.xlu1 %4604 }
 0x360   : > { %v4699_v51 = vsel %vm1135_vm6, %v8035_v8, %v4605_v19 }
 0x361   : > { %5265 = vst.msk [vmem:[%s7865_s21 + $0x10] sm:$0xff] %vm3062_vm10, %v4730_v63  ;;  %v4731_v50 = vadd.f32 %v7860_v10, %v4699_v51  ;;  %v4615_v6 = vpop.permute.xlu0 %4614 }
 0x362   : > { %v4704_v34 = vsel %vm1135_vm6, %v8040_v11, %v4615_v6 }
 0x363   : > { %5266 = vst.msk [vmem:[%s7865_s21 + $0x18] sm:$0xff] %vm3062_vm10, %v4731_v50  ;;  %v4736_v24 = vadd.f32 %v7860_v10, %v4704_v34  ;;  %v4617_v28 = vpop.permute.xlu1 %4616 }
 0x364   : > { %v4705_v57 = vsel %vm1135_vm6, %v8045_v47, %v4617_v28 }
 0x365   : > { %5271 = vst.msk [vmem:[%s7865_s21 + $0x70] sm:$0xff] %vm3062_vm10, %v4736_v24  ;;  %v4737_v8 = vadd.f32 %v7860_v10, %v4705_v57  ;;  %v4611_v33 = vpop.permute.xlu0 %4610 }
 0x366   : > { %v4702_v60 = vsel %vm1135_vm6, %v8042_v55, %v4611_v33 }
 0x367   : > { %5272 = vst.msk [vmem:[%s7865_s21 + $0x78] sm:$0xff] %vm3062_vm10, %v4737_v8  ;;  %v4734_v11 = vadd.f32 %v7860_v10, %v4702_v60  ;;  %v4613_v36 = vpop.permute.xlu1 %4612 }
 0x368   : > { %v4703_v40 = vsel %vm1135_vm6, %v8047_v29, %v4613_v36 }
 0x369   : > { %5269 = vst.msk [vmem:[%s7865_s21 + $0x50] sm:$0xff] %vm3062_vm10, %v4734_v11  ;;  %v4735_v47 = vadd.f32 %v7860_v10, %v4703_v40  ;;  %v4623_v16 = vpop.permute.xlu0 %4622 }
 0x36a   : > { %v4708_v1 = vsel %vm1135_vm6, %v8052_v30, %v4623_v16 }
 0x36b   : > { %5270 = vst.msk [vmem:[%s7865_s21 + $0x58] sm:$0xff] %vm3062_vm10, %v4735_v47  ;;  %v4740_v55 = vadd.f32 %v7860_v10, %v4708_v1  ;;  %v4625_v20 = vpop.permute.xlu1 %4624 }
 0x36c   : > { %v4709_v31 = vsel %vm1135_vm6, %v8057_v12, %v4625_v20 }
 0x36d   : > { %5275 = vst.msk [vmem:[%s7865_s21 + $0xb0] sm:$0xff] %vm3062_vm10, %v4740_v55  ;;  %v4741_v29 = vadd.f32 %v7860_v10, %v4709_v31  ;;  %v4619_v62 = vpop.permute.xlu0 %4618 }
 0x36e   : > { %v4706_v35 = vsel %vm1135_vm6, %v8054_v2, %v4619_v62 }
 0x36f   : > { %5276 = vst.msk [vmem:[%s7865_s21 + $0xb8] sm:$0xff] %vm3062_vm10, %v4741_v29  ;;  %v4738_v30 = vadd.f32 %v7860_v10, %v4706_v35  ;;  %v4621_v41 = vpop.permute.xlu1 %4620 }
 0x370   : > { %v4707_v9 = vsel %vm1135_vm6, %v8059_v18, %v4621_v41 }
 0x371   : > { %5273 = vst.msk [vmem:[%s7865_s21 + $0x90] sm:$0xff] %vm3062_vm10, %v4738_v30  ;;  %v4739_v12 = vadd.f32 %v7860_v10, %v4707_v9  ;;  %v4631_v53 = vpop.permute.xlu0 %4630 }
 0x372   : > { %v4712_v15 = vsel %vm1135_vm6, %v8064_v54, %v4631_v53 }
 0x373   : > { %5274 = vst.msk [vmem:[%s7865_s21 + $0x98] sm:$0xff] %vm3062_vm10, %v4739_v12  ;;  %v4744_v2 = vadd.f32 %v7860_v10, %v4712_v15  ;;  %v4633_v48 = vpop.permute.xlu1 %4632 }
 0x374   : > { %v4713_v42 = vsel %vm1135_vm6, %v8069_v17, %v4633_v48 }
 0x375   : > { %5279 = vst.msk [vmem:[%s7865_s21 + $0xf0] sm:$0xff] %vm3062_vm10, %v4744_v2  ;;  %v4745_v18 = vadd.f32 %v7860_v10, %v4713_v42  ;;  %v4627_v0 = vpop.permute.xlu0 %4626 }
 0x376   : > { %v4710_v44 = vsel %vm1135_vm6, %v8066_v59, %v4627_v0 }
 0x377   : > { %5280 = vst.msk [vmem:[%s7865_s21 + $0xf8] sm:$0xff] %vm3062_vm10, %v4745_v18  ;;  %v4742_v54 = vadd.f32 %v7860_v10, %v4710_v44  ;;  %v4629_v61 = vpop.permute.xlu1 %4628 }
 0x378   : > { %v4711_v14 = vsel %vm1135_vm6, %v8071_v43, %v4629_v61 }
 0x379   : > { %5277 = vst.msk [vmem:[%s7865_s21 + $0xd0] sm:$0xff] %vm3062_vm10, %v4742_v54  ;;  %v4743_v17 = vadd.f32 %v7860_v10, %v4711_v14  ;;  %v4639_v4 = vpop.permute.xlu0 %4638 }
 0x37a   : > { %v4716_v27 = vsel %vm1135_vm6, %v8076_v58, %v4639_v4 }
 0x37b   : > { %5278 = vst.msk [vmem:[%s7865_s21 + $0xd8] sm:$0xff] %vm3062_vm10, %v4743_v17  ;;  %v4748_v59 = vadd.f32 %v7860_v10, %v4716_v27  ;;  %v4641_v32 = vpop.permute.xlu1 %4640 }
 0x37c   : > { %v4717_v38 = vsel %vm1135_vm6, %v8081_v22, %v4641_v32 }
 0x37d   : > { %5283 = vst.msk [vmem:[%s7865_s21 + $0x130] sm:$0xff] %vm3062_vm10, %v4748_v59  ;;  %v4749_v43 = vadd.f32 %v7860_v10, %v4717_v38  ;;  %v4635_v46 = vpop.permute.xlu0 %4634 }
 0x37e   : > { %v4714_v63 = vsel %vm1135_vm6, %v8078_v5, %v4635_v46 }
 0x37f   : > { %5284 = vst.msk [vmem:[%s7865_s21 + $0x138] sm:$0xff] %vm3062_vm10, %v4749_v43  ;;  %v4746_v58 = vadd.f32 %v7860_v10, %v4714_v63  ;;  %v4637_v19 = vpop.permute.xlu1 %4636 }
 0x380   : > { %v4715_v51 = vsel %vm1135_vm6, %v8083_v21, %v4637_v19 }
 0x381   : > { %5281 = vst.msk [vmem:[%s7865_s21 + $0x110] sm:$0xff] %vm3062_vm10, %v4746_v58  ;;  %v4747_v22 = vadd.f32 %v7860_v10, %v4715_v51  ;;  %v4647_v50 = vpop.permute.xlu0 %4646 }
 0x382   : > { %v4720_v6 = vsel %vm1135_vm6, %v8088_v37, %v4647_v50 }
 0x383   : > { %5282 = vst.msk [vmem:[%s7865_s21 + $0x118] sm:$0xff] %vm3062_vm10, %v4747_v22  ;;  %v4752_v5 = vadd.f32 %v7860_v10, %v4720_v6  ;;  %v4649_v34 = vpop.permute.xlu1 %4648 }
 0x384   : > { %v4721_v24 = vsel %vm1135_vm6, %v8093_v56, %v4649_v34 }
 0x385   : > { %5287 = vst.msk [vmem:[%s7865_s21 + $0x170] sm:$0xff] %vm3062_vm10, %v4752_v5  ;;  %v4753_v21 = vadd.f32 %v7860_v10, %v4721_v24  ;;  %v4643_v28 = vpop.permute.xlu0 %4642 }
 0x386   : > { %v4718_v57 = vsel %vm1135_vm6, %v8090_v45, %v4643_v28 }
 0x387   : > { %5288 = vst.msk [vmem:[%s7865_s21 + $0x178] sm:$0xff] %vm3062_vm10, %v4753_v21  ;;  %v4750_v37 = vadd.f32 %v7860_v10, %v4718_v57  ;;  %v4645_v8 = vpop.permute.xlu1 %4644 }
 0x388   : > { %v4719_v33 = vsel %vm1135_vm6, %v8095_v23, %v4645_v8 }
 0x389   : > { %5285 = vst.msk [vmem:[%s7865_s21 + $0x150] sm:$0xff] %vm3062_vm10, %v4750_v37  ;;  %v4751_v56 = vadd.f32 %v7860_v10, %v4719_v33  ;;  %v4655_v60 = vpop.permute.xlu0 %4654 }
 0x38a   : > { %v4724_v11 = vsel %vm1135_vm6, %v8100_v49, %v4655_v60 }
 0x38b   : > { %5286 = vst.msk [vmem:[%s7865_s21 + $0x158] sm:$0xff] %vm3062_vm10, %v4751_v56  ;;  %v4756_v45 = vadd.f32 %v7860_v10, %v4724_v11  ;;  %v4657_v36 = vpop.permute.xlu1 %4656 }
 0x38c   : > { %v4725_v40 = vsel %vm1135_vm6, %v8105_v13, %v4657_v36 }
 0x38d   : > { %5291 = vst.msk [vmem:[%s7865_s21 + $0x1b0] sm:$0xff] %vm3062_vm10, %v4756_v45  ;;  %v4757_v23 = vadd.f32 %v7860_v10, %v4725_v40  ;;  %v4651_v47 = vpop.permute.xlu0 %4650 }
 0x38e   : > { %v4722_v16 = vsel %vm1135_vm6, %v8102_v39, %v4651_v47 }
 0x38f   : > { %5292 = vst.msk [vmem:[%s7865_s21 + $0x1b8] sm:$0xff] %vm3062_vm10, %v4757_v23  ;;  %v4754_v49 = vadd.f32 %v7860_v10, %v4722_v16  ;;  %v4653_v1 = vpop.permute.xlu1 %4652 }
 0x390   : > { %v4723_v55 = vsel %vm1135_vm6, %v8107_v3, %v4653_v1 }
 0x391   : > { %5289 = vst.msk [vmem:[%s7865_s21 + $0x190] sm:$0xff] %vm3062_vm10, %v4754_v49  ;;  %v4755_v13 = vadd.f32 %v7860_v10, %v4723_v55 }
 0x392   : > { %v4659_v20 = vpop.permute.xlu0 %4658 }
 0x393   : > { %5290 = vst.msk [vmem:[%s7865_s21 + $0x198] sm:$0xff] %vm3062_vm10, %v4755_v13  ;;  %v4726_v39 = vsel %vm1135_vm6, %v8114_v26, %v4659_v20 }
 0x394   : > { %v4758_v31 = vadd.f32 %v7860_v10, %v4726_v39  ;;  %v4661_v29 = vpop.permute.xlu1 %4660 }
 0x395   : > { %v4727_v62 = vsel %vm1135_vm6, %v8119_v7, %v4661_v29 }
 0x396   : > { %5293 = vst.msk [vmem:[%s7865_s21 + $0x1d0] sm:$0xff] %vm3062_vm10, %v4758_v31  ;;  %v4759_v3 = vadd.f32 %v7860_v10, %v4727_v62  ;;  %v4663_v35 = vpop.permute.xlu0 %4662 }
 0x397   : > { %v4728_v30 = vsel %vm1135_vm6, %v8111_v25, %v4663_v35 }
 0x398   : > { %5294 = vst.msk [vmem:[%s7865_s21 + $0x1d8] sm:$0xff] %vm3062_vm10, %v4759_v3  ;;  %v4760_v41 = vadd.f32 %v7860_v10, %v4728_v30  ;;  %v4665_v9 = vpop.permute.xlu1 %4664 }
 0x399   : > { %v4729_v26 = vsel %vm1135_vm6, %v8116_v52, %v4665_v9 }
 0x39a   : > { %5295 = vst.msk [vmem:[%s7865_s21 + $0x1f0] sm:$0xff] %vm3062_vm10, %v4760_v41  ;;  %v4761_v7 = vadd.f32 %v7860_v10, %v4729_v26 }
 0x39c   : > { %5296 = vst.msk [vmem:[%s7865_s21 + $0x1f8] sm:$0xff] %vm3062_vm10, %v4761_v7 }
 0x39d PF: > { %s14_s17 = sadd.s32 1, %s6574_s17   ;;  %s8375_s15 = smov %s6570_s16 }
 0x39e   : > { %p11_p5 = scmp.ge.s32.totalorder %s14_s17, 4   ;;  %s8376_s16 = smov %s8378_s18 }
 0x3a0   :  { %13 = sbr.rel (!%p11_p5) target bundleno = 2 (0x2), region = 86 }

</bundles_post_ra>
